<compile_context>
chip_gen: v7x
topology: tpu7x:2x2x1
jax: 0.10.0
libtpu: 0.0.40
codegen_flags: <defaults>
</compile_context>

<pallas_src>
import jax
import jax.numpy as jnp
from jax.experimental import pallas as pl
from jax.experimental.pallas import tpu as pltpu


# ----------------------------------------------------------------------------
# Fused kernel: per batch element, for src and tgt:
#   squared-norm over channels -> descending rank of every point -> one-hot
#   MXU gather of [points ; embeddings] at the top-K ranked points.
# ----------------------------------------------------------------------------
def _keypointnet_kernel(src_ref, tgt_ref, semb_ref, temb_ref,
                        src_kp_ref, tgt_kp_ref, semb_kp_ref, temb_kp_ref):
    N = src_ref.shape[-1]
    Kp = src_kp_ref.shape[-1]                      # padded keypoint count (mult of 128)
    KT = 256 if Kp % 256 == 0 else 128             # 256-wide tiles fill v6e/v7x MXU

    def select_and_gather(pts_ref, emb_ref, pts_out_ref, emb_out_ref):
        pts = pts_ref[0]                           # (C1, N)
        emb = emb_ref[0]                           # (D,  N)
        x = emb.astype(jnp.float32)

        # Squared L2 norm over channels (monotone in the norm, so the induced
        # ranking matches torch.norm + topk).
        n_row = jnp.sum(x * x, axis=0, keepdims=True)                     # (1, N)

        # Rank of every point under (descending norm, ascending index):
        # a vectorized, K-independent replacement for top-k that stays fully
        # inside the kernel.  NOTE: for very large N (>~2048) the (N, N)
        # pairwise block should be tiled over the lane axis; at PRNet sizes it
        # fits comfortably.
        ii = jax.lax.broadcasted_iota(jnp.int32, (N, N), 0)               # j (sublane)
        jj = jax.lax.broadcasted_iota(jnp.int32, (N, N), 1)               # k (lane)
        # Bit-exact lane->sublane relayout of n_row via select+reduce (keeps
        # the pairwise comparison a strict total order; avoids relying on
        # small-shape transpose lowering).
        n_col = jnp.sum(jnp.where(ii == jj, n_row, 0.0),
                        axis=1, keepdims=True)                            # (N, 1)
        # beats[j, k] = "point k beats point j"  (larger norm, or tie & lower index)
        beats = (n_row > n_col) | ((n_row == n_col) & (jj < ii))          # (N, N)
        rank = jnp.sum(beats.astype(jnp.int32), axis=1, keepdims=True)    # (N, 1)

        # One-hot gather on the MXU, tiled KT output lanes at a time so the
        # (N, KT) one-hot stays small; precision=HIGHEST keeps the gather
        # bit-exact for f32 data (no bf16 truncation of coordinates).
        dims = (((1,), (0,)), ((), ()))
        for c0 in range(0, Kp, KT):                # static loop; lane-dense stores
            cols = jax.lax.broadcasted_iota(jnp.int32, (N, KT), 1) + c0
            onehot = (rank == cols).astype(jnp.float32)                   # (N, KT)
            pts_out_ref[0, :, c0:c0 + KT] = jax.lax.dot_general(
                pts.astype(jnp.float32), onehot, dims,
                precision=jax.lax.Precision.HIGHEST,
                preferred_element_type=jnp.float32).astype(pts_out_ref.dtype)
            emb_out_ref[0, :, c0:c0 + KT] = jax.lax.dot_general(
                x, onehot, dims,
                precision=jax.lax.Precision.HIGHEST,
                preferred_element_type=jnp.float32).astype(emb_out_ref.dtype)

    select_and_gather(src_ref, semb_ref, src_kp_ref, semb_kp_ref)
    select_and_gather(tgt_ref, temb_ref, tgt_kp_ref, temb_kp_ref)


def keypointnet_forward_padded(src, tgt, src_embedding, tgt_embedding,
                               num_keypoints):
    """Fused KeyPointNet forward.  Returns lane-dense Kp-padded slabs
    (src_kp, tgt_kp, src_emb, tgt_emb) with Kp = ceil(K/128)*128; only the
    first K lanes of each output are meaningful."""
    B, C1, N = src.shape
    _, D, _ = src_embedding.shape
    K = int(num_keypoints)
    Kp = pl.cdiv(K, 128) * 128

    in_map = lambda b: (b, 0, 0)
    return pl.pallas_call(
        _keypointnet_kernel,
        out_shape=(jax.ShapeDtypeStruct((B, C1, Kp), src.dtype),
                   jax.ShapeDtypeStruct((B, C1, Kp), tgt.dtype),
                   jax.ShapeDtypeStruct((B, D, Kp), src_embedding.dtype),
                   jax.ShapeDtypeStruct((B, D, Kp), tgt_embedding.dtype)),
        grid=(B,),
        in_specs=[pl.BlockSpec((1, C1, N), in_map),
                  pl.BlockSpec((1, C1, N), in_map),
                  pl.BlockSpec((1, D, N), in_map),
                  pl.BlockSpec((1, D, N), in_map)],
        out_specs=(pl.BlockSpec((1, C1, Kp), in_map),
                   pl.BlockSpec((1, C1, Kp), in_map),
                   pl.BlockSpec((1, D, Kp), in_map),
                   pl.BlockSpec((1, D, Kp), in_map)),
        compiler_params=pltpu.CompilerParams(
            dimension_semantics=("parallel",)),    # megacore shard on v7x
    )(src, tgt, src_embedding, tgt_embedding)


# ----------------------------------------------------------------------------
# KeyPointNet forward (no learnable parameters in this module).
# ----------------------------------------------------------------------------
class KeyPointNet:
    def __init__(self, num_keypoints):
        self.num_keypoints = num_keypoints

    def __call__(self, src, tgt, src_embedding, tgt_embedding):
        skp, tkp, semb, temb = keypointnet_forward_padded(
            src, tgt, src_embedding, tgt_embedding, self.num_keypoints)
        K = self.num_keypoints
        # Slice the Kp padding off only at the module boundary (to match the
        # PyTorch output shapes); consumers that tolerate padded lanes should
        # call keypointnet_forward_padded directly to keep lane-dense slabs.
        return skp[..., :K], tkp[..., :K], semb[..., :K], temb[..., :K]


# ----------------------------------------------------------------------------
# Pure-JAX reference (semantics of the PyTorch module) for a silent check.
# ----------------------------------------------------------------------------
def _ref_forward(src, tgt, src_embedding, tgt_embedding, k):
    src_norm = jnp.linalg.norm(src_embedding, axis=1)      # (B, N)
    tgt_norm = jnp.linalg.norm(tgt_embedding, axis=1)
    _, src_idx = jax.lax.top_k(src_norm, k)
    _, tgt_idx = jax.lax.top_k(tgt_norm, k)

    def gather(x, idx):
        return jnp.take_along_axis(x, idx[:, None, :], axis=2)

    return (gather(src, src_idx), gather(tgt, tgt_idx),
            gather(src_embedding, src_idx), gather(tgt_embedding, tgt_idx))


if __name__ == "__main__":
    B, D, N, K = 2, 32, 128, 8     # batch, embedding dims, points, keypoints

    key = jax.random.PRNGKey(0)
    k1, k2, k3, k4 = jax.random.split(key, 4)
    src = jax.random.normal(k1, (B, 3, N), dtype=jnp.float32)
    tgt = jax.random.normal(k2, (B, 3, N), dtype=jnp.float32)
    src_embedding = jax.random.normal(k3, (B, D, N), dtype=jnp.float32)
    tgt_embedding = jax.random.normal(k4, (B, D, N), dtype=jnp.float32)

    model = KeyPointNet(num_keypoints=K)
    outs = model(src, tgt, src_embedding, tgt_embedding)
    outs = jax.block_until_ready(outs)

    refs = _ref_forward(src, tgt, src_embedding, tgt_embedding, K)
    for o, r in zip(outs, refs):
        assert o.shape == r.shape and o.dtype == r.dtype
        assert jnp.allclose(o, r, atol=1e-5, rtol=1e-5)

    print("KERNEL_OK")
</pallas_src>

<mosaic_0001>
module attributes {stable_mosaic.version = 11 : i64} {
  func.func @_keypointnet_kernel(%arg0: i32, %arg1: memref<1x3x128xf32, #tpu.memory_space<vmem>>, %arg2: memref<1x3x128xf32, #tpu.memory_space<vmem>>, %arg3: memref<1x32x128xf32, #tpu.memory_space<vmem>>, %arg4: memref<1x32x128xf32, #tpu.memory_space<vmem>>, %arg5: memref<1x3x128xf32, #tpu.memory_space<vmem>>, %arg6: memref<1x3x128xf32, #tpu.memory_space<vmem>>, %arg7: memref<1x32x128xf32, #tpu.memory_space<vmem>>, %arg8: memref<1x32x128xf32, #tpu.memory_space<vmem>>) attributes {dimension_semantics = [#tpu.dimension_semantics<parallel>], iteration_bounds = array<i64: 2>, scalar_prefetch = 0 : i64, scratch_operands = 0 : i64, tpu.core_type = #tpu.core_type<tc>, window_params = [{transform_indices = @transform_0, window_bounds = array<i64: 1, 3, 128>}, {transform_indices = @transform_1, window_bounds = array<i64: 1, 3, 128>}, {transform_indices = @transform_2, window_bounds = array<i64: 1, 32, 128>}, {transform_indices = @transform_3, window_bounds = array<i64: 1, 32, 128>}, {transform_indices = @transform_4, window_bounds = array<i64: 1, 3, 128>}, {transform_indices = @transform_5, window_bounds = array<i64: 1, 3, 128>}, {transform_indices = @transform_6, window_bounds = array<i64: 1, 32, 128>}, {transform_indices = @transform_7, window_bounds = array<i64: 1, 32, 128>}]} {
    %c0 = arith.constant 0 : index
    %c0_0 = arith.constant 0 : index
    %c0_1 = arith.constant 0 : index
    %0 = vector.load %arg1[%c0, %c0_0, %c0_1] : memref<1x3x128xf32, #tpu.memory_space<vmem>>, vector<1x3x128xf32>
    %1 = vector.shape_cast %0 : vector<1x3x128xf32> to vector<3x128xf32>
    %c0_2 = arith.constant 0 : index
    %c0_3 = arith.constant 0 : index
    %c0_4 = arith.constant 0 : index
    %2 = vector.load %arg3[%c0_2, %c0_3, %c0_4] : memref<1x32x128xf32, #tpu.memory_space<vmem>>, vector<1x32x128xf32>
    %3 = vector.shape_cast %2 : vector<1x32x128xf32> to vector<32x128xf32>
    %4 = arith.mulf %3, %3 : vector<32x128xf32>
    %cst = arith.constant dense<0.000000e+00> : vector<128xf32>
    %5 = vector.multi_reduction <add>, %4, %cst [0] : vector<32x128xf32> to vector<128xf32>
    %6 = vector.shape_cast %5 : vector<128xf32> to vector<1x128xf32>
    %7 = tpu.iota {dimensions = array<i32: 0>} : vector<128x128xi32>
    %8 = tpu.iota {dimensions = array<i32: 1>} : vector<128x128xi32>
    %9 = arith.cmpi eq, %7, %8 : vector<128x128xi32>
    %cst_5 = arith.constant 0.000000e+00 : f32
    %10 = vector.shape_cast %6 : vector<1x128xf32> to vector<1x128xf32>
    %11 = vector.broadcast %10 : vector<1x128xf32> to vector<128x128xf32>
    %12 = vector.broadcast %cst_5 : f32 to vector<128x128xf32>
    %13 = arith.select %9, %11, %12 : vector<128x128xi1>, vector<128x128xf32>
    %cst_6 = arith.constant dense<0.000000e+00> : vector<128xf32>
    %14 = vector.multi_reduction <add>, %13, %cst_6 [1] : vector<128x128xf32> to vector<128xf32>
    %15 = vector.shape_cast %14 : vector<128xf32> to vector<128x1xf32>
    %16 = vector.broadcast %6 : vector<1x128xf32> to vector<128x128xf32>
    %17 = vector.broadcast %15 : vector<128x1xf32> to vector<128x128xf32>
    %18 = arith.cmpf ogt, %16, %17 : vector<128x128xf32>
    %19 = vector.broadcast %6 : vector<1x128xf32> to vector<128x128xf32>
    %20 = vector.broadcast %15 : vector<128x1xf32> to vector<128x128xf32>
    %21 = arith.cmpf oeq, %19, %20 : vector<128x128xf32>
    %22 = arith.cmpi slt, %8, %7 : vector<128x128xi32>
    %23 = arith.andi %21, %22 : vector<128x128xi1>
    %24 = arith.ori %18, %23 : vector<128x128xi1>
    %25 = arith.extui %24 : vector<128x128xi1> to vector<128x128xi32>
    %cst_7 = arith.constant dense<0> : vector<128xi32>
    %26 = vector.multi_reduction <add>, %25, %cst_7 [1] : vector<128x128xi32> to vector<128xi32>
    %27 = vector.shape_cast %26 : vector<128xi32> to vector<128x1xi32>
    %28 = tpu.iota {dimensions = array<i32: 1>} : vector<128x128xi32>
    %c0_i32 = arith.constant 0 : i32
    %29 = vector.broadcast %c0_i32 : i32 to vector<128x128xi32>
    %30 = arith.addi %28, %29 : vector<128x128xi32>
    %31 = vector.broadcast %27 : vector<128x1xi32> to vector<128x128xi32>
    %32 = arith.cmpi eq, %31, %30 : vector<128x128xi32>
    %33 = arith.extui %32 : vector<128x128xi1> to vector<128x128xi32>
    %34 = arith.sitofp %33 : vector<128x128xi32> to vector<128x128xf32>
    %cst_8 = arith.constant dense<0.000000e+00> : vector<3x128xf32>
    %35 = tpu.matmul %1, %34, %cst_8 {dimension_numbers = #tpu.dot_dimension_numbers<[1], [0], [0], [1], [0, 0, 1, 1], [], []>, precision = #tpu.contract_precision<fp32>} : vector<3x128xf32>, vector<128x128xf32>, vector<3x128xf32> -> vector<3x128xf32>
    %c0_9 = arith.constant 0 : index
    %c0_10 = arith.constant 0 : index
    %c0_11 = arith.constant 0 : index
    %36 = vector.load %arg5[%c0_9, %c0_10, %c0_11] : memref<1x3x128xf32, #tpu.memory_space<vmem>>, vector<1x3x128xf32>
    %37 = vector.shape_cast %36 : vector<1x3x128xf32> to vector<3x128xf32>
    %38 = vector.shape_cast %35 : vector<3x128xf32> to vector<1x3x128xf32>
    tpu.vector_store %arg5[%c0_9, %c0_10, %c0_11], %38 {strides = array<i32>} : memref<1x3x128xf32, #tpu.memory_space<vmem>>, vector<1x3x128xf32>,
    %cst_12 = arith.constant dense<0.000000e+00> : vector<32x128xf32>
    %39 = tpu.matmul %3, %34, %cst_12 {dimension_numbers = #tpu.dot_dimension_numbers<[1], [0], [0], [1], [0, 0, 1, 1], [], []>, precision = #tpu.contract_precision<fp32>} : vector<32x128xf32>, vector<128x128xf32>, vector<32x128xf32> -> vector<32x128xf32>
    %c0_13 = arith.constant 0 : index
    %c0_14 = arith.constant 0 : index
    %c0_15 = arith.constant 0 : index
    %40 = vector.load %arg7[%c0_13, %c0_14, %c0_15] : memref<1x32x128xf32, #tpu.memory_space<vmem>>, vector<1x32x128xf32>
    %41 = vector.shape_cast %40 : vector<1x32x128xf32> to vector<32x128xf32>
    %42 = vector.shape_cast %39 : vector<32x128xf32> to vector<1x32x128xf32>
    tpu.vector_store %arg7[%c0_13, %c0_14, %c0_15], %42 {strides = array<i32>} : memref<1x32x128xf32, #tpu.memory_space<vmem>>, vector<1x32x128xf32>,
    %c0_16 = arith.constant 0 : index
    %c0_17 = arith.constant 0 : index
    %c0_18 = arith.constant 0 : index
    %43 = vector.load %arg2[%c0_16, %c0_17, %c0_18] : memref<1x3x128xf32, #tpu.memory_space<vmem>>, vector<1x3x128xf32>
    %44 = vector.shape_cast %43 : vector<1x3x128xf32> to vector<3x128xf32>
    %c0_19 = arith.constant 0 : index
    %c0_20 = arith.constant 0 : index
    %c0_21 = arith.constant 0 : index
    %45 = vector.load %arg4[%c0_19, %c0_20, %c0_21] : memref<1x32x128xf32, #tpu.memory_space<vmem>>, vector<1x32x128xf32>
    %46 = vector.shape_cast %45 : vector<1x32x128xf32> to vector<32x128xf32>
    %47 = arith.mulf %46, %46 : vector<32x128xf32>
    %cst_22 = arith.constant dense<0.000000e+00> : vector<128xf32>
    %48 = vector.multi_reduction <add>, %47, %cst_22 [0] : vector<32x128xf32> to vector<128xf32>
    %49 = vector.shape_cast %48 : vector<128xf32> to vector<1x128xf32>
    %50 = tpu.iota {dimensions = array<i32: 0>} : vector<128x128xi32>
    %51 = tpu.iota {dimensions = array<i32: 1>} : vector<128x128xi32>
    %52 = arith.cmpi eq, %50, %51 : vector<128x128xi32>
    %cst_23 = arith.constant 0.000000e+00 : f32
    %53 = vector.shape_cast %49 : vector<1x128xf32> to vector<1x128xf32>
    %54 = vector.broadcast %53 : vector<1x128xf32> to vector<128x128xf32>
    %55 = vector.broadcast %cst_23 : f32 to vector<128x128xf32>
    %56 = arith.select %52, %54, %55 : vector<128x128xi1>, vector<128x128xf32>
    %cst_24 = arith.constant dense<0.000000e+00> : vector<128xf32>
    %57 = vector.multi_reduction <add>, %56, %cst_24 [1] : vector<128x128xf32> to vector<128xf32>
    %58 = vector.shape_cast %57 : vector<128xf32> to vector<128x1xf32>
    %59 = vector.broadcast %49 : vector<1x128xf32> to vector<128x128xf32>
    %60 = vector.broadcast %58 : vector<128x1xf32> to vector<128x128xf32>
    %61 = arith.cmpf ogt, %59, %60 : vector<128x128xf32>
    %62 = vector.broadcast %49 : vector<1x128xf32> to vector<128x128xf32>
    %63 = vector.broadcast %58 : vector<128x1xf32> to vector<128x128xf32>
    %64 = arith.cmpf oeq, %62, %63 : vector<128x128xf32>
    %65 = arith.cmpi slt, %51, %50 : vector<128x128xi32>
    %66 = arith.andi %64, %65 : vector<128x128xi1>
    %67 = arith.ori %61, %66 : vector<128x128xi1>
    %68 = arith.extui %67 : vector<128x128xi1> to vector<128x128xi32>
    %cst_25 = arith.constant dense<0> : vector<128xi32>
    %69 = vector.multi_reduction <add>, %68, %cst_25 [1] : vector<128x128xi32> to vector<128xi32>
    %70 = vector.shape_cast %69 : vector<128xi32> to vector<128x1xi32>
    %71 = tpu.iota {dimensions = array<i32: 1>} : vector<128x128xi32>
    %c0_i32_26 = arith.constant 0 : i32
    %72 = vector.broadcast %c0_i32_26 : i32 to vector<128x128xi32>
    %73 = arith.addi %71, %72 : vector<128x128xi32>
    %74 = vector.broadcast %70 : vector<128x1xi32> to vector<128x128xi32>
    %75 = arith.cmpi eq, %74, %73 : vector<128x128xi32>
    %76 = arith.extui %75 : vector<128x128xi1> to vector<128x128xi32>
    %77 = arith.sitofp %76 : vector<128x128xi32> to vector<128x128xf32>
    %cst_27 = arith.constant dense<0.000000e+00> : vector<3x128xf32>
    %78 = tpu.matmul %44, %77, %cst_27 {dimension_numbers = #tpu.dot_dimension_numbers<[1], [0], [0], [1], [0, 0, 1, 1], [], []>, precision = #tpu.contract_precision<fp32>} : vector<3x128xf32>, vector<128x128xf32>, vector<3x128xf32> -> vector<3x128xf32>
    %c0_28 = arith.constant 0 : index
    %c0_29 = arith.constant 0 : index
    %c0_30 = arith.constant 0 : index
    %79 = vector.load %arg6[%c0_28, %c0_29, %c0_30] : memref<1x3x128xf32, #tpu.memory_space<vmem>>, vector<1x3x128xf32>
    %80 = vector.shape_cast %79 : vector<1x3x128xf32> to vector<3x128xf32>
    %81 = vector.shape_cast %78 : vector<3x128xf32> to vector<1x3x128xf32>
    tpu.vector_store %arg6[%c0_28, %c0_29, %c0_30], %81 {strides = array<i32>} : memref<1x3x128xf32, #tpu.memory_space<vmem>>, vector<1x3x128xf32>,
    %cst_31 = arith.constant dense<0.000000e+00> : vector<32x128xf32>
    %82 = tpu.matmul %46, %77, %cst_31 {dimension_numbers = #tpu.dot_dimension_numbers<[1], [0], [0], [1], [0, 0, 1, 1], [], []>, precision = #tpu.contract_precision<fp32>} : vector<32x128xf32>, vector<128x128xf32>, vector<32x128xf32> -> vector<32x128xf32>
    %c0_32 = arith.constant 0 : index
    %c0_33 = arith.constant 0 : index
    %c0_34 = arith.constant 0 : index
    %83 = vector.load %arg8[%c0_32, %c0_33, %c0_34] : memref<1x32x128xf32, #tpu.memory_space<vmem>>, vector<1x32x128xf32>
    %84 = vector.shape_cast %83 : vector<1x32x128xf32> to vector<32x128xf32>
    %85 = vector.shape_cast %82 : vector<32x128xf32> to vector<1x32x128xf32>
    tpu.vector_store %arg8[%c0_32, %c0_33, %c0_34], %85 {strides = array<i32>} : memref<1x32x128xf32, #tpu.memory_space<vmem>>, vector<1x32x128xf32>,
    return
  }
  func.func @transform_0(%arg0: i32) -> (i32, i32, i32) {
    %c0_i32 = arith.constant 0 : i32
    %c0_i32_0 = arith.constant 0 : i32
    %c0_i32_1 = arith.constant 0 : i32
    return %arg0, %c0_i32, %c0_i32_0 : i32, i32, i32
  }
  func.func @transform_1(%arg0: i32) -> (i32, i32, i32) {
    %c0_i32 = arith.constant 0 : i32
    %c0_i32_0 = arith.constant 0 : i32
    %c0_i32_1 = arith.constant 0 : i32
    return %arg0, %c0_i32, %c0_i32_0 : i32, i32, i32
  }
  func.func @transform_2(%arg0: i32) -> (i32, i32, i32) {
    %c0_i32 = arith.constant 0 : i32
    %c0_i32_0 = arith.constant 0 : i32
    %c0_i32_1 = arith.constant 0 : i32
    return %arg0, %c0_i32, %c0_i32_0 : i32, i32, i32
  }
  func.func @transform_3(%arg0: i32) -> (i32, i32, i32) {
    %c0_i32 = arith.constant 0 : i32
    %c0_i32_0 = arith.constant 0 : i32
    %c0_i32_1 = arith.constant 0 : i32
    return %arg0, %c0_i32, %c0_i32_0 : i32, i32, i32
  }
  func.func @transform_4(%arg0: i32) -> (i32, i32, i32) {
    %c0_i32 = arith.constant 0 : i32
    %c0_i32_0 = arith.constant 0 : i32
    %c0_i32_1 = arith.constant 0 : i32
    return %arg0, %c0_i32, %c0_i32_0 : i32, i32, i32
  }
  func.func @transform_5(%arg0: i32) -> (i32, i32, i32) {
    %c0_i32 = arith.constant 0 : i32
    %c0_i32_0 = arith.constant 0 : i32
    %c0_i32_1 = arith.constant 0 : i32
    return %arg0, %c0_i32, %c0_i32_0 : i32, i32, i32
  }
  func.func @transform_6(%arg0: i32) -> (i32, i32, i32) {
    %c0_i32 = arith.constant 0 : i32
    %c0_i32_0 = arith.constant 0 : i32
    %c0_i32_1 = arith.constant 0 : i32
    return %arg0, %c0_i32, %c0_i32_0 : i32, i32, i32
  }
  func.func @transform_7(%arg0: i32) -> (i32, i32, i32) {
    %c0_i32 = arith.constant 0 : i32
    %c0_i32_0 = arith.constant 0 : i32
    %c0_i32_1 = arith.constant 0 : i32
    return %arg0, %c0_i32, %c0_i32_0 : i32, i32, i32
  }
}

</mosaic_0001>

<bundles_post_ra>
// kernel: tpu_custom_call.1
= control target key start
LH: loop header
LB: loop body
LE: loop exit
PB: predicated region body
PF: predicated region fallthrough
CT: control target
= control target key end

     0   :  { %s9033_s0 = inlined_call_operand.vmem [shape: f32[2,3,128], index: 0, kind: input, shape index: {}]   ;;  %s9034_s1 = inlined_call_operand.vmem [shape: f32[2,3,128], index: 1, kind: input, shape index: {}]   ;;  %s9035_s2 = inlined_call_operand.hbm [shape: f32[2,32,128], index: 2, kind: input, shape index: {}]   ;;  %s9036_s3 = inlined_call_operand.hbm [shape: f32[2,32,128], index: 3, kind: input, shape index: {}]   ;;  %s9037_s4 = inlined_call_operand.vmem [shape: f32[2,3,128], index: 4, kind: output, shape index: {0}]   ;;  %s9038_s5 = inlined_call_operand.vmem [shape: f32[2,3,128], index: 5, kind: output, shape index: {1}]   ;;  %s9039_s6 = inlined_call_operand.hbm [shape: f32[2,32,128], index: 6, kind: output, shape index: {2}]   ;;  %s9040_s7 = inlined_call_operand.hbm [shape: f32[2,32,128], index: 7, kind: output, shape index: {3}]  }
   0x1   :  { %9140 = sst [smem:[#allocation34_spill]] %s9035_s2 }
   0x2   :  { %13 = vsyncpa [#allocation3], 0 }
   0x3   :  { %15 = vsyncpa [#allocation3 + $0x1], 0 }
   0x4   :  { %16 = vsyncpa [#allocation6], 0 }
   0x5   :  { %18 = vsyncpa [#allocation6 + $0x1], 0 }
   0x6   :  { %19 = vsyncpa [#allocation4], 0 }
   0x7   :  { %21 = vsyncpa [#allocation4 + $0x1], 0 }
   0x8   :  { %22 = vsyncpa [#allocation9], 0 }
   0x9   :  { %24 = vsyncpa [#allocation9 + $0x1], 0  ;;  %s6900_s24 = smov 0   ;;  %s6902_s25 = smov 0  }
   0xa   :  { %s6904_s26 = smov 0   ;;  %s6906_s27 = smov 0  }
   0xb LB: > { %s6921_s28 = sadd.s32 4294967295, %s6845_s27   ;;  %s4306_s29 = sadd.s32 4294967294, %s6845_s27   ;;  %s6845_s27 = sphi %s6906_s27, %s9318_s27   ;;  %s6841_s26 = sphi %s6904_s26, %s9317_s26   ;;  %s6837_s25 = sphi %s6902_s25, %s9316_s25   ;;  %s6833_s24 = sphi %s6900_s24, %s9315_s24  }
   0xc   : > { %s6925_s30 = sadd.s32 1, %s6845_s27   ;;  %s89_s8 = sadd.s32 1, %s6841_s26 }
   0xd   : > { %s86_s9 = ssub.s32 %s6845_s27, %s6925_s30  ;;  %p96_p0 = scmp.ne.s32.totalorder %s6841_s26, %s6837_s25 }
   0xe   : > { %p87_p1 = scmp.eq.s32.totalorder %s86_s9, 0  ;;  %p97_p2 = scmp.eq.s32.totalorder %s6845_s27, 0 }
   0xf   : > { %p102_p3 = scmp.ne.s32.totalorder %s6837_s25, %s6833_s24  ;;  %p103_p4 = scmp.eq.s32.totalorder %s6921_s28, 0 }
  0x10   : > { %s6937_s10 = scalar_select %p87_p1, %s6841_s26, %s89_s8  }
  0x11   : > { %p6939_p5 = por %p97_p2, %p96_p0  ;;  %p6943_p6 = por %p103_p4, %p102_p3 }
  0x12   : > { %9141 = sst [smem:[#allocation14_spill]] %s6937_s10  ;;  %p204_p7 = scmp.eq.s32.totalorder %s6921_s28, 1 }
  0x13   : > { %s9143_s12 = scalar_select %p6943_p6, 1, 0 }
  0x14   : > { %p210_p8 = scmp.eq.s32.totalorder %s4306_s29, 1  ;;  %p6634_p10 = scmp.lt.s32.totalorder %s6845_s27, 2 }
  0x15   : > { %p6950_p11 = por %p204_p7, %p96_p0  ;;  %s6959_s15 = sand.u32 1, %s6841_s26  }
  0x16   : > { %p6954_p12 = por %p210_p8, %p102_p3  ;;  %s4556_s16 = sshll.u32 %s6845_s27, 9 }
  0x17   : > { %s9144_s13 = scalar_select %p6950_p11, 1, 0 }
  0x18   : > { %s9145_s14 = scalar_select %p6954_p12, 1, 0 }
  0x19   : > { %s9041_s17 = sshll.u32 %s6959_s15, 5  ;;  %s9146_s2 = sld [smem:[#allocation34_spill]] }
  0x1a   : > { %s274_s21 = scalar_lea.vmem [#allocation2], %s9041_s17  ;;  %p6974_p13 = pnand %p6634_p10, %p6939_p5 }
  0x1b   : > { %s281_s22 = sshll.u32 %s274_s21, 4  ;;  %s271_s29 = scalar_lea.sflag [#allocation3], %s6959_s15  ;;  %s6978_s22 = int_to_ptr.vmem [resolvable:$true] %s281_s22 }
  0x1c   : > { %p6685_p1 = pneg %p6974_p13 }
  0x1f   : > { %s6968_s20 = scalar_lea.hbm %s9146_s2, %s4556_s16  ;;  %s6688_s11 = scalar_lea.hbm %s9146_s2, 1024 }
  0x20   : > { %s6683_s8 = scalar_lea.hbm %s6968_s20, 512  ;;  %p6689_p4 = scmp.lt.u32.totalorder %s6968_s20, %s9146_s2 }
  0x21   : > { %p6684_p0 = scmp.ne.s32.totalorder %s6968_s20, %s6683_s8  ;;  %p6690_p5 = scmp.lt.u32.totalorder %s6688_s11, %s6683_s8 }
  0x22   : > { %p6692_p8 = scmp.lt.u32.totalorder %s6683_s8, %s6968_s20 }
  0x23   : > { %p6686_p2 = pnand %p6685_p1, %p6684_p0  ;;  %p6691_p7 = por %p6690_p5, %p6689_p4 }
  0x25   : > { %p6687_p3 = pneg %p6686_p2  ;;  %p6693_p10 = por %p6692_p8, %p6691_p7 }
  0x27   : > { %p6694_p9 = pnand %p6693_p10, %p6687_p3 }
  0x29   : > { %6697 = shalt.err (!%p6694_p9)
}
  0x2a   : > { %s6698_s17 = scalar_lea.vmem %s6978_s22, 512  ;;  %s6847_s9 = smov [#allocation2]  }
  0x2b   : > { %p6699_p0 = scmp.ne.s32.totalorder %s6978_s22, %s6698_s17  ;;  %s6703_s18 = sshll.u32 %s6847_s9, 4  ;;  %s6704_s18 = int_to_ptr.vmem [resolvable:$false] %s6703_s18 }
  0x2c   : > { %s6705_s19 = scalar_lea.vmem %s6704_s18, 1024  ;;  %p6706_p11 = scmp.lt.s32.totalorder %s6978_s22, %s6704_s18 }
  0x2d   : > { %p6701_p2 = pnand %p6699_p0, %p6685_p1  ;;  %p6707_p4 = scmp.lt.s32.totalorder %s6705_s19, %s6698_s17 }
  0x2f   : > { %p6702_p12 = pneg %p6701_p2  ;;  %p6708_p5 = por %p6707_p4, %p6706_p11 }
  0x31   : > { %p6709_p7 = pnand %p6708_p5, %p6702_p12 }
  0x33   : > { %6712 = shalt.err (!%p6709_p7)
}
  0x34   : > { %s9043_s8 = smov 128   ;;  %s6849_s11 = smov 8  }
  0x35   : > { %6623 = dma.hbm_to_vmem [thread:$0]  (!%p6974_p13), %s6968_s20, 512, %s6978_s22, %s271_s29, %s9043_s8, %s9043_s8, %s6849_s11  }
  0x36   : > { %p4315_p9 = scmp.ge.s32.totalorder %s6845_s27, 1  ;;  %p310_p11 = scmp.lt.s32.totalorder %s6845_s27, 3 }
  0x37   : > { %s7022_s18 = scalar_lea.hbm %s9036_s3, %s4556_s16  ;;  %s9149_s19 = sshll.u32 %s6959_s15, 5 }
  0x38   : > { %p7013_p12 = pnand %p4315_p9, %p310_p11  ;;  %s295_s2 = scalar_lea.vmem [#allocation5], %s9149_s19 }
  0x39   : > { %s302_s10 = sshll.u32 %s295_s2, 4  ;;  %s292_s20 = scalar_lea.sflag [#allocation6], %s6959_s15  ;;  %s7026_s10 = int_to_ptr.vmem [resolvable:$true] %s302_s10 }
  0x3a   : > { %s6713_s22 = scalar_lea.hbm %s7022_s18, 512  ;;  %s6718_s16 = scalar_lea.hbm %s9036_s3, 1024 }
  0x3b   : > { %p6714_p3 = scmp.ne.s32.totalorder %s7022_s18, %s6713_s22  ;;  %p6719_p0 = scmp.lt.u32.totalorder %s7022_s18, %s9036_s3 }
  0x3c   : > { %p6720_p2 = scmp.lt.u32.totalorder %s6718_s16, %s6713_s22  ;;  %p6722_p5 = scmp.lt.u32.totalorder %s6713_s22, %s7022_s18 }
  0x3d   : > { %p6716_p8 = pnand %p6714_p3, %p6685_p1 }
  0x3e   : > { %p6721_p4 = por %p6720_p2, %p6719_p0 }
  0x3f   : > { %p6717_p10 = pneg %p6716_p8 }
  0x40   : > { %p6723_p7 = por %p6722_p5, %p6721_p4 }
  0x42   : > { %p6724_p9 = pnand %p6723_p7, %p6717_p10 }
  0x44   : > { %6727 = shalt.err (!%p6724_p9)
}
  0x45   : > { %s6728_s2 = scalar_lea.vmem %s7026_s10, 512  ;;  %s6850_s19 = smov [#allocation5]  }
  0x46   : > { %p6729_p11 = scmp.ne.s32.totalorder %s7026_s10, %s6728_s2  ;;  %s6733_s29 = sshll.u32 %s6850_s19, 4  ;;  %s6734_s29 = int_to_ptr.vmem [resolvable:$false] %s6733_s29 }
  0x47   : > { %s6735_s8 = scalar_lea.vmem %s6734_s29, 1024  ;;  %p6736_p6 = scmp.lt.s32.totalorder %s7026_s10, %s6734_s29 }
  0x48   : > { %p6731_p3 = pnand %p6729_p11, %p6685_p1  ;;  %p6737_p0 = scmp.lt.s32.totalorder %s6735_s8, %s6728_s2 }
  0x4a   : > { %p6732_p8 = pneg %p6731_p3  ;;  %p6738_p2 = por %p6737_p0, %p6736_p6 }
  0x4c   : > { %p6739_p4 = pnand %p6738_p2, %p6732_p8 }
  0x4e   : > { %6742 = shalt.err (!%p6739_p4)
}
  0x4f   : > { %s9150_s22 = smov 128   ;;  %314 = sbr.rel (%p7013_p12) target bundleno = 1088 (0x440), region = 36 }
  0x50   : > { %6626 = dma.hbm_to_vmem [thread:$0]  (!%p6974_p13), %s7022_s18, 512, %s7026_s10, %s292_s20, %s9150_s22, %s9150_s22, %s6849_s11  }
  0x56   : > { %s7060_s21 = sand.u32 1, %s6837_s25   ;;  %p9151_p6 = scmp.ne.s32.totalorder %s9143_s12, 0 }
  0x57   : > { %s7063_s16 = sshll.u32 %s7060_s21, 5  ;;  %s317_s23 = scalar_lea.sflag [#allocation3], %s7060_s21 }
  0x58   : > { %s7067_s9 = scalar_lea.vmem [#allocation2], %s7063_s16 }
  0x59   : > { %6816 = dma.done.wait (%p9151_p6), %s317_s23, 512  }
  0x5a   : > { %6818 = vsyncadd (%p9151_p6), %s317_s23, 4294966784  ;;  %s326_s10 = scalar_lea.sflag [#allocation6], %s7060_s21  ;;  %s7075_s15 = scalar_lea.vmem [#allocation5], %s7063_s16 }
  0x5b   : > { %6820 = dma.done.wait (%p9151_p6), %s326_s10, 512  }
  0x5c   : > { %6822 = vsyncadd (%p9151_p6), %s326_s10, 4294966784  ;;  %v7082_v0 = vld [vmem:[%s7067_s9] sm:$0xff]  ;;  %v7085_v1 = vld [vmem:[%s7067_s9 + $0x8] sm:$0xff]  ;;  %v420_v11 = vlaneseq  ;;  %v9074_v54 = vmov 0   ;;  %p386_p13 = scmp.lt.s32.totalorder %s6921_s28, 1  ;;  %p9311_p12 = scmp.ne.s32.totalorder %s9144_s13, 0 }
  0x5d   : > { %v7088_v2 = vld [vmem:[%s7067_s9 + $0x10] sm:$0xff]  ;;  %v7091_v3 = vld [vmem:[%s7067_s9 + $0x18] sm:$0xff]  ;;  %v407_v4 = vmul.f32 %v7082_v0, %v7082_v0  ;;  %v408_v5 = vmul.f32 %v7085_v1, %v7085_v1  ;;  %s6856_s19 = smov [#allocation7]  }
  0x5e   : > { %v409_v6 = vmul.f32 %v7088_v2, %v7088_v2  ;;  %v410_v7 = vmul.f32 %v7091_v3, %v7091_v3  ;;  %v7101_v14 = vshrl.u32 %v420_v11, 7  ;;  %v7103_v16 = vand.u32 127, %v420_v11  ;;  %s387_s12 = scalar_select %p386_p13, %s6921_s28, 1 }
  0x5f   : > { %v411_v8 = vadd.f32 %v408_v5, %v407_v4 }
  0x60   : > { %v7106_v17 = vadd.s32 16, %v7101_v14  ;;  %v7109_v19 = vadd.s32 8, %v7101_v14  ;;  %v7112_v20 = vadd.s32 24, %v7101_v14  ;;  %vm439_vm0 = vcmp.eq.s32.totalorder %v7101_v14, %v7103_v16  ;;  %s7584_s11 = sshll.u32 %s387_s12, 2 }
  0x61   : > { %v412_v9 = vadd.f32 %v411_v8, %v409_v6  ;;  %v7125_v23 = vadd.s32 32, %v7101_v14  ;;  %v7128_v24 = vadd.s32 40, %v7101_v14  ;;  %v7151_v29 = vadd.s32 48, %v7101_v14  ;;  %s389_s20 = scalar_lea.vmem %s9033_s0, %s7584_s11  ;;  %s393_s29 = scalar_lea.vmem %s9034_s1, %s7584_s11 }
  0x62   : > { %vm441_vm1 = vcmp.eq.s32.totalorder %v7106_v17, %v7103_v16  ;;  %vm440_vm2 = vcmp.eq.s32.totalorder %v7109_v19, %v7103_v16  ;;  %vm442_vm3 = vcmp.eq.s32.totalorder %v7112_v20, %v7103_v16  ;;  %v7154_v30 = vadd.s32 56, %v7101_v14  ;;  %s397_s23 = scalar_lea.vmem %s9037_s4, %s7584_s11 }
  0x63   : > { %v413_v10 = vadd.f32 %v412_v9, %v410_v7  ;;  %vm9056_vm4 = vcmp.eq.s32.totalorder %v7125_v23, %v7103_v16  ;;  %vm9055_vm5 = vcmp.eq.s32.totalorder %v7128_v24, %v7103_v16  ;;  %vm9054_vm6 = vcmp.eq.s32.totalorder %v7151_v29, %v7103_v16 }
  0x64   : > { %vm9053_vm7 = vcmp.eq.s32.totalorder %v7154_v30, %v7103_v16  ;;  %v7169_v33 = vadd.s32 64, %v7101_v14  ;;  %v7172_v34 = vadd.s32 72, %v7101_v14  ;;  %v7187_v37 = vadd.s32 80, %v7101_v14 }
  0x65   : > { %v414_v12 = vrot.slane %v413_v10, 4  ;;  %v7190_v38 = vadd.s32 88, %v7101_v14  ;;  %v7205_v41 = vadd.s32 96, %v7101_v14  ;;  %v7208_v42 = vadd.s32 104, %v7101_v14 }
  0x66   : > { %vm9052_vm8 = vcmp.eq.s32.totalorder %v7169_v33, %v7103_v16  ;;  %vm9051_vm9 = vcmp.eq.s32.totalorder %v7172_v34, %v7103_v16  ;;  %vm9048_vm10 = vcmp.eq.s32.totalorder %v7187_v37, %v7103_v16  ;;  %v7223_v45 = vadd.s32 112, %v7101_v14 }
  0x67   : > { %v415_v13 = vadd.f32 %v414_v12, %v413_v10  ;;  %vm9047_vm11 = vcmp.eq.s32.totalorder %v7190_v38, %v7103_v16  ;;  %vm9046_vm12 = vcmp.eq.s32.totalorder %v7205_v41, %v7103_v16  ;;  %vm9045_vm13 = vcmp.eq.s32.totalorder %v7208_v42, %v7103_v16 }
  0x68   : > { %v7226_v46 = vadd.s32 120, %v7101_v14  ;;  %vm9049_vm14 = vcmp.eq.s32.totalorder %v7223_v45, %v7103_v16 }
  0x69   : > { %v416_v15 = vrot.slane %v415_v13, 2 }
  0x6a   : > { %vm9050_vm15 = vcmp.eq.s32.totalorder %v7226_v46, %v7103_v16 }
  0x6b   : > { %v417_v18 = vadd.f32 %v416_v15, %v415_v13 }
  0x6d   : > { %v418_v21 = vrot.slane %v417_v18, 1 }
  0x6f   : > { %v7118_v22 = vadd.f32 %v418_v21, %v417_v18 }
  0x71   : > { %v455_v25 = vsel %vm439_vm0, %v7118_v22, 0.0  ;;  %v457_v26 = vsel %vm441_vm1, %v7118_v22, 0.0  ;;  %v456_v27 = vsel %vm440_vm2, %v7118_v22, 0.0  ;;  %v458_v28 = vsel %vm442_vm3, %v7118_v22, 0.0 }
  0x72   : > { %471 = vadd.xlane.f32.xlu0 %v455_v25  ;;  %475 = vadd.xlane.f32.xlu1 %v457_v26  ;;  %v459_v31 = vsel %vm9056_vm4, %v7118_v22, 0.0  ;;  %v460_v32 = vsel %vm9055_vm5, %v7118_v22, 0.0  ;;  %v461_v35 = vsel %vm9054_vm6, %v7118_v22, 0.0  ;;  %v462_v36 = vsel %vm9053_vm7, %v7118_v22, 0.0 }
  0x73   : > { %v463_v39 = vsel %vm9052_vm8, %v7118_v22, 0.0  ;;  %v464_v40 = vsel %vm9051_vm9, %v7118_v22, 0.0  ;;  %v465_v43 = vsel %vm9048_vm10, %v7118_v22, 0.0  ;;  %v466_v44 = vsel %vm9047_vm11, %v7118_v22, 0.0 }
  0x74   : > { %v467_v47 = vsel %vm9046_vm12, %v7118_v22, 0.0  ;;  %v468_v48 = vsel %vm9045_vm13, %v7118_v22, 0.0  ;;  %v469_v49 = vsel %vm9049_vm14, %v7118_v22, 0.0  ;;  %v470_v50 = vsel %vm9050_vm15, %v7118_v22, 0.0 }
  0x75   : > { %vm9057_vm13 = vcmp.lt.s32.totalorder %v7103_v16, %v7101_v14  ;;  %vm9058_vm10 = vcmp.lt.s32.totalorder %v7103_v16, %v7106_v17  ;;  %vm536_vm7 = vcmp.lt.s32.totalorder %v7103_v16, %v7109_v19 }
  0x76   : > { %473 = vadd.xlane.f32.xlu0 %v456_v27  ;;  %477 = vadd.xlane.f32.xlu1 %v458_v28 }
  0x7a   : > { %479 = vadd.xlane.f32.xlu0 %v459_v31  ;;  %481 = vadd.xlane.f32.xlu1 %v460_v32 }
  0x7e   : > { %483 = vadd.xlane.f32.xlu0 %v461_v35  ;;  %485 = vadd.xlane.f32.xlu1 %v462_v36 }
  0x82   : > { %487 = vadd.xlane.f32.xlu0 %v463_v39  ;;  %489 = vadd.xlane.f32.xlu1 %v464_v40 }
  0x86   : > { %491 = vadd.xlane.f32.xlu0 %v465_v43  ;;  %493 = vadd.xlane.f32.xlu1 %v466_v44 }
  0x8a   : > { %495 = vadd.xlane.f32.xlu0 %v467_v47  ;;  %497 = vadd.xlane.f32.xlu1 %v468_v48 }
  0x8e   : > { %499 = vadd.xlane.f32.xlu0 %v469_v49  ;;  %501 = vadd.xlane.f32.xlu1 %v470_v50 }
  0xff   : > { %v472_v51 = vpop.xlane.xlu0 %471  ;;  %v476_v52 = vpop.xlane.xlu1 %475 }
 0x100   : > { %vm503_vm12 = vcmp.gt.f32.partialorder %v7118_v22, %v472_v51  ;;  %vm519_vm11 = vcmp.eq.f32.partialorder %v7118_v22, %v472_v51  ;;  %vm521_vm14 = vcmp.eq.f32.partialorder %v7118_v22, %v476_v52  ;;  %vm505_vm9 = vcmp.gt.f32.partialorder %v7118_v22, %v476_v52  ;;  %v2256_v52 = vld [vmem:[%s7075_s15] sm:$0xff] }
 0x101   : > { %vm551_vm15 = vmand %vm519_vm11, %vm9057_vm13 }
 0x102   : > { %vm567_vm8 = vmor %vm503_vm12, %vm551_vm15  ;;  %vm9125_vm12 = vcmp.lt.s32.totalorder %v7103_v16, %v7112_v20 }
 0x103   : > { %v474_v53 = vpop.xlane.xlu0 %473  ;;  %vm553_vm6 = vmand %vm521_vm14, %vm9058_vm10  ;;  %v583_v55 = vsel %vm567_vm8, 1, %v9074_v54  ;;  %v478_v56 = vpop.xlane.xlu1 %477 }
 0x104   : > { %vm504_vm5 = vcmp.gt.f32.partialorder %v7118_v22, %v474_v53  ;;  %vm520_vm4 = vcmp.eq.f32.partialorder %v7118_v22, %v474_v53  ;;  %vm569_vm11 = vmor %vm505_vm9, %vm553_vm6  ;;  %v600_v57 = vshrl.u32 %v583_v55, 16  ;;  %vm506_vm13 = vcmp.gt.f32.partialorder %v7118_v22, %v478_v56  ;;  %v2257_v53 = vld [vmem:[%s7075_s15 + $0x8] sm:$0xff] }
 0x105   : > { %vm552_vm15 = vmand %vm520_vm4, %vm536_vm7  ;;  %vm522_vm14 = vcmp.eq.f32.partialorder %v7118_v22, %v478_v56  ;;  %v585_v58 = vsel %vm569_vm11, 1, %v9074_v54  ;;  %v599_v60 = vand.u32 65535, %v583_v55  ;;  %vm9059_vm6 = vcmp.lt.s32.totalorder %v7103_v16, %v7125_v23 }
 0x106   : > { %vm568_vm8 = vmor %vm504_vm5, %vm552_vm15  ;;  %v602_v59 = vcvt.s32.f32 %v600_v57  ;;  %vm9060_vm4 = vcmp.lt.s32.totalorder %v7103_v16, %v7128_v24  ;;  %v624_v5 = vshrl.u32 %v585_v58, 16  ;;  %v623_v21 = vand.u32 65535, %v585_v58 }
 0x107   : > { %vm554_vm9 = vmand %vm522_vm14, %vm9125_vm12  ;;  %v584_v61 = vsel %vm568_vm8, 1, %v9074_v54  ;;  %v480_v62 = vpop.xlane.xlu0 %479  ;;  %v482_v63 = vpop.xlane.xlu1 %481  ;;  %v601_v6 = vcvt.s32.f32 %v599_v60  ;;  %v2261_v60 = vmul.f32 %v2257_v53, %v2257_v53 }
 0x108   : > { %605 = vadd.xlane.f32.xlu0 %v602_v59  ;;  %vm570_vm10 = vmor %vm506_vm13, %vm554_vm9  ;;  %v612_v4 = vshrl.u32 %v584_v61, 16  ;;  %vm507_vm5 = vcmp.gt.f32.partialorder %v7118_v22, %v480_v62  ;;  %vm523_vm11 = vcmp.eq.f32.partialorder %v7118_v22, %v480_v62  ;;  %vm524_vm14 = vcmp.eq.f32.partialorder %v7118_v22, %v482_v63 }
 0x109   : > { %vm555_vm15 = vmand %vm523_vm11, %vm9059_vm6  ;;  %v611_v8 = vand.u32 65535, %v584_v61  ;;  %v586_v9 = vsel %vm570_vm10, 1, %v9074_v54  ;;  %vm508_vm13 = vcmp.gt.f32.partialorder %v7118_v22, %v482_v63  ;;  %v626_v11 = vcvt.s32.f32 %v624_v5  ;;  %v2258_v63 = vld [vmem:[%s7075_s15 + $0x10] sm:$0xff] }
 0x10a   : > { %v614_v7 = vcvt.s32.f32 %v612_v4  ;;  %vm571_vm8 = vmor %vm507_vm5, %vm555_vm15  ;;  %v636_v12 = vshrl.u32 %v586_v9, 16  ;;  %vm9067_vm11 = vcmp.lt.s32.totalorder %v7103_v16, %v7151_v29  ;;  %v625_v31 = vcvt.s32.f32 %v623_v21 }
 0x10b   : > { %vm556_vm9 = vmand %vm524_vm14, %vm9060_vm4  ;;  %v484_v10 = vpop.xlane.xlu0 %483  ;;  %v587_v13 = vsel %vm571_vm8, 1, %v9074_v54  ;;  %v486_v15 = vpop.xlane.xlu1 %485  ;;  %v613_v18 = vcvt.s32.f32 %v611_v8  ;;  %vm9061_vm14 = vcmp.lt.s32.totalorder %v7103_v16, %v7154_v30  ;;  %v635_v32 = vand.u32 65535, %v586_v9 }
 0x10c   : > { %603 = vadd.xlane.f32.xlu0 %v601_v6  ;;  %617 = vadd.xlane.f32.xlu1 %v614_v7  ;;  %vm525_vm6 = vcmp.eq.f32.partialorder %v7118_v22, %v484_v10  ;;  %vm572_vm10 = vmor %vm508_vm13, %vm556_vm9  ;;  %vm509_vm5 = vcmp.gt.f32.partialorder %v7118_v22, %v484_v10  ;;  %v638_v25 = vcvt.s32.f32 %v636_v12  ;;  %v648_v26 = vshrl.u32 %v587_v13, 16  ;;  %v2259_v12 = vld [vmem:[%s7075_s15 + $0x18] sm:$0xff] }
 0x10d   : > { %vm557_vm15 = vmand %vm525_vm6, %vm9067_vm11  ;;  %vm526_vm4 = vcmp.eq.f32.partialorder %v7118_v22, %v486_v15  ;;  %v588_v27 = vsel %vm572_vm10, 1, %v9074_v54  ;;  %vm510_vm13 = vcmp.gt.f32.partialorder %v7118_v22, %v486_v15  ;;  %vm9062_vm9 = vcmp.lt.s32.totalorder %v7103_v16, %v7169_v33 }
 0x10e   : > { %vm573_vm8 = vmor %vm509_vm5, %vm557_vm15  ;;  %v650_v35 = vcvt.s32.f32 %v648_v26  ;;  %v660_v36 = vshrl.u32 %v588_v27, 16  ;;  %v647_v39 = vand.u32 65535, %v587_v13  ;;  %v637_v44 = vcvt.s32.f32 %v635_v32 }
 0x10f   : > { %v488_v28 = vpop.xlane.xlu0 %487  ;;  %vm558_vm6 = vmand %vm526_vm4, %vm9061_vm14  ;;  %v589_v40 = vsel %vm573_vm8, 1, %v9074_v54  ;;  %v490_v43 = vpop.xlane.xlu1 %489  ;;  %vm9063_vm14 = vcmp.lt.s32.totalorder %v7103_v16, %v7172_v34  ;;  %v659_v55 = vand.u32 65535, %v588_v27  ;;  %v2260_v59 = vmul.f32 %v2256_v52, %v2256_v52 }
 0x110   : > { %629 = vadd.xlane.f32.xlu0 %v626_v11  ;;  %615 = vadd.xlane.f32.xlu1 %v613_v18  ;;  %vm527_vm10 = vcmp.eq.f32.partialorder %v7118_v22, %v488_v28  ;;  %vm574_vm5 = vmor %vm510_vm13, %vm558_vm6  ;;  %vm511_vm15 = vcmp.gt.f32.partialorder %v7118_v22, %v488_v28  ;;  %v662_v47 = vcvt.s32.f32 %v660_v36  ;;  %v649_v48 = vcvt.s32.f32 %v647_v39 }
 0x111   : > { %vm559_vm4 = vmand %vm527_vm10, %vm9062_vm9  ;;  %v672_v49 = vshrl.u32 %v589_v40, 16  ;;  %vm528_vm8 = vcmp.eq.f32.partialorder %v7118_v22, %v490_v43  ;;  %v590_v50 = vsel %vm574_vm5, 1, %v9074_v54  ;;  %vm512_vm6 = vcmp.gt.f32.partialorder %v7118_v22, %v490_v43 }
 0x112   : > { %vm575_vm13 = vmor %vm511_vm15, %vm559_vm4  ;;  %vm9064_vm9 = vcmp.lt.s32.totalorder %v7103_v16, %v7187_v37  ;;  %v684_v57 = vshrl.u32 %v590_v50, 16  ;;  %v671_v58 = vand.u32 65535, %v589_v40  ;;  %v661_v4 = vcvt.s32.f32 %v659_v55 }
 0x113   : > { %v492_v51 = vpop.xlane.xlu0 %491  ;;  %vm560_vm10 = vmand %vm528_vm8, %vm9063_vm14  ;;  %v674_v56 = vcvt.s32.f32 %v672_v49  ;;  %v591_v61 = vsel %vm575_vm13, 1, %v9074_v54  ;;  %v494_v62 = vpop.xlane.xlu1 %493  ;;  %vm9065_vm14 = vcmp.lt.s32.totalorder %v7103_v16, %v7190_v38  ;;  %v2262_v8 = vmul.f32 %v2258_v63, %v2258_v63 }
 0x114   : > { %627 = vadd.xlane.f32.xlu0 %v625_v31  ;;  %641 = vadd.xlane.f32.xlu1 %v638_v25  ;;  %vm529_vm5 = vcmp.eq.f32.partialorder %v7118_v22, %v492_v51  ;;  %vm576_vm15 = vmor %vm512_vm6, %vm560_vm10  ;;  %vm513_vm4 = vcmp.gt.f32.partialorder %v7118_v22, %v492_v51  ;;  %v686_v5 = vcvt.s32.f32 %v684_v57  ;;  %v673_v6 = vcvt.s32.f32 %v671_v58 }
 0x115   : > { %vm561_vm8 = vmand %vm529_vm5, %vm9064_vm9  ;;  %v696_v7 = vshrl.u32 %v591_v61, 16  ;;  %vm530_vm13 = vcmp.eq.f32.partialorder %v7118_v22, %v494_v62  ;;  %v2264_v9 = vadd.f32 %v2261_v60, %v2260_v59  ;;  %v592_v10 = vsel %vm576_vm15, 1, %v9074_v54 }
 0x116   : > { %vm577_vm6 = vmor %vm513_vm4, %vm561_vm8  ;;  %v683_v13 = vand.u32 65535, %v590_v50  ;;  %vm514_vm10 = vcmp.gt.f32.partialorder %v7118_v22, %v494_v62  ;;  %vm9066_vm9 = vcmp.lt.s32.totalorder %v7103_v16, %v7205_v41  ;;  %v708_v21 = vshrl.u32 %v592_v10, 16 }
 0x117   : > { %v496_v11 = vpop.xlane.xlu0 %495  ;;  %vm7348_vm5 = vmand %vm530_vm13, %vm9065_vm14  ;;  %v698_v18 = vcvt.s32.f32 %v696_v7  ;;  %v695_v25 = vand.u32 65535, %v591_v61  ;;  %v2263_v26 = vmul.f32 %v2259_v12, %v2259_v12  ;;  %v2265_v27 = vadd.f32 %v2264_v9, %v2262_v8  ;;  %v498_v31 = vpop.xlane.xlu1 %497 }
 0x118   : > { %639 = vadd.xlane.f32.xlu1 %v637_v44  ;;  %653 = vadd.xlane.f32.xlu0 %v650_v35  ;;  %vm531_vm15 = vcmp.eq.f32.partialorder %v7118_v22, %v496_v11  ;;  %v593_v28 = vsel %vm577_vm6, 1, %v9074_v54  ;;  %v9086_v32 = vmov 0.0|0.0   ;;  %v685_v35 = vcvt.s32.f32 %v683_v13  ;;  %vm578_vm4 = vmor %vm514_vm10, %vm7348_vm5 }
 0x119   : > { %5880 = vmatprep.subr.bf16.mxu0 %v9086_v32  ;;  %vm515_vm8 = vcmp.gt.f32.partialorder %v7118_v22, %v496_v11  ;;  %vm563_vm13 = vmand %vm531_vm15, %vm9066_vm9  ;;  %vm9068_vm14 = vcmp.lt.s32.totalorder %v7103_v16, %v7208_v42  ;;  %v710_v36 = vcvt.s32.f32 %v708_v21  ;;  %v697_v39 = vcvt.s32.f32 %v695_v25 }
 0x11a   : > { %v720_v40 = vshrl.u32 %v593_v28, 16  ;;  %vm532_vm6 = vcmp.eq.f32.partialorder %v7118_v22, %v498_v31  ;;  %v2266_v43 = vadd.f32 %v2265_v27, %v2263_v26  ;;  %v594_v44 = vsel %vm578_vm4, 1, %v9074_v54  ;;  %vm579_vm10 = vmor %vm515_vm8, %vm563_vm13 }
 0x11b   : > { %vm516_vm5 = vcmp.gt.f32.partialorder %v7118_v22, %v498_v31  ;;  %vm564_vm15 = vmand %vm532_vm6, %vm9068_vm14  ;;  %vm9109_vm9 = vcmp.lt.s32.totalorder %v7103_v16, %v7223_v45  ;;  %v732_v50 = vshrl.u32 %v594_v44, 16  ;;  %v719_v51 = vand.u32 65535, %v593_v28  ;;  %v502_v55 = vpop.xlane.xlu1 %501 }
 0x11c   : > { %665 = vadd.xlane.f32.xlu1 %v662_v47  ;;  %651 = vadd.xlane.f32.xlu0 %v649_v48  ;;  %v500_v47 = vpop.xlane.xlu0 %499  ;;  %v707_v48 = vand.u32 65535, %v592_v10  ;;  %v722_v49 = vcvt.s32.f32 %v720_v40  ;;  %v2267_v52 = vrot.slane %v2266_v43, 4  ;;  %v595_v53 = vsel %vm579_vm10, 1, %v9074_v54  ;;  %vm580_vm4 = vmor %vm516_vm5, %vm564_vm15 }
 0x11d   : > { %vm533_vm11 = vcmp.eq.f32.partialorder %v7118_v22, %v500_v47  ;;  %vm517_vm8 = vcmp.gt.f32.partialorder %v7118_v22, %v500_v47  ;;  %vm9106_vm6 = vcmp.lt.s32.totalorder %v7103_v16, %v7226_v46  ;;  %v734_v57 = vcvt.s32.f32 %v732_v50 }
 0x11e   : > { %vm565_vm13 = vmand %vm533_vm11, %vm9109_vm9  ;;  %v721_v58 = vcvt.s32.f32 %v719_v51  ;;  %v744_v59 = vshrl.u32 %v595_v53, 16  ;;  %vm534_vm14 = vcmp.eq.f32.partialorder %v7118_v22, %v502_v55  ;;  %v2268_v60 = vadd.f32 %v2267_v52, %v2266_v43 }
 0x11f   : > { %v596_v61 = vsel %vm580_vm4, 1, %v9074_v54  ;;  %vm581_vm10 = vmor %vm517_vm8, %vm565_vm13  ;;  %v731_v62 = vand.u32 65535, %v594_v44  ;;  %vm518_vm5 = vcmp.gt.f32.partialorder %v7118_v22, %v502_v55  ;;  %v7430_v52 = vand.u32 4294901760, %v7082_v0 }
 0x120   : > { %663 = vadd.xlane.f32.xlu1 %v661_v4  ;;  %677 = vadd.xlane.f32.xlu0 %v674_v56  ;;  %v709_v56 = vcvt.s32.f32 %v707_v48  ;;  %vm566_vm11 = vmand %vm534_vm14, %vm9106_vm6  ;;  %v746_v63 = vcvt.s32.f32 %v744_v59  ;;  %v756_v4 = vshrl.u32 %v596_v61, 16  ;;  %v597_v7 = vsel %vm581_vm10, 1, %v9074_v54 }
 0x121   : > { %v733_v8 = vcvt.s32.f32 %v731_v62  ;;  %vm582_vm15 = vmor %vm518_vm5, %vm566_vm11  ;;  %v768_v11 = vshrl.u32 %v597_v7, 16  ;;  %v755_v13 = vand.u32 65535, %v596_v61  ;;  %v767_v21 = vand.u32 65535, %v597_v7 }
 0x122   : > { %v758_v9 = vcvt.s32.f32 %v756_v4  ;;  %v598_v12 = vsel %vm582_vm15, 1, %v9074_v54  ;;  %vm9158_vm14 = vcmp.eq.s32.totalorder %v7169_v33, %v7103_v16  ;;  %vm9159_vm4 = vcmp.eq.s32.totalorder %v7172_v34, %v7103_v16 }
 0x123   : > { %v770_v15 = vcvt.s32.f32 %v768_v11  ;;  %v757_v26 = vcvt.s32.f32 %v755_v13  ;;  %v769_v28 = vcvt.s32.f32 %v767_v21  ;;  %vm9160_vm8 = vcmp.eq.s32.totalorder %v7187_v37, %v7103_v16 }
 0x124   : > { %689 = vadd.xlane.f32.xlu1 %v686_v5  ;;  %675 = vadd.xlane.f32.xlu0 %v673_v6  ;;  %v743_v5 = vand.u32 65535, %v595_v53  ;;  %v2269_v6 = vrot.slane %v2268_v60, 2  ;;  %vm9162_vm13 = vcmp.eq.s32.totalorder %v7190_v38, %v7103_v16  ;;  %vm9163_vm10 = vcmp.eq.s32.totalorder %v7205_v41, %v7103_v16 }
 0x125   : > { %vm9164_vm5 = vcmp.eq.s32.totalorder %v7208_v42, %v7103_v16  ;;  %vm9165_vm11 = vcmp.eq.s32.totalorder %v7223_v45, %v7103_v16  ;;  %vm9120_vm15 = vmmov 0  }
 0x126   : > { %v745_v10 = vcvt.s32.f32 %v743_v5  ;;  %v2270_v22 = vadd.f32 %v2269_v6, %v2268_v60 }
 0x128   : > { %687 = vadd.xlane.f32.xlu1 %v685_v35  ;;  %701 = vadd.xlane.f32.xlu0 %v698_v18  ;;  %v780_v18 = vshrl.u32 %v598_v12, 16  ;;  %v2271_v25 = vrot.slane %v2270_v22, 1  ;;  %v779_v35 = vand.u32 65535, %v598_v12 }
 0x12a   : > { %v782_v27 = vcvt.s32.f32 %v780_v18  ;;  %v7391_v31 = vadd.f32 %v2271_v25, %v2270_v22 }
 0x12c   : > { %713 = vadd.xlane.f32.xlu1 %v710_v36  ;;  %699 = vadd.xlane.f32.xlu0 %v697_v39  ;;  %v2273_v36 = vsel %vm439_vm0, %v7391_v31, 0.0  ;;  %v781_v39 = vcvt.s32.f32 %v779_v35  ;;  %v2274_v40 = vsel %vm440_vm2, %v7391_v31, 0.0  ;;  %v2275_v43 = vsel %vm441_vm1, %v7391_v31, 0.0 }
 0x12d   : > { %v2276_v44 = vsel %vm442_vm3, %v7391_v31, 0.0  ;;  %vm9154_vm0 = vcmp.eq.s32.totalorder %v7125_v23, %v7103_v16  ;;  %vm9155_vm2 = vcmp.eq.s32.totalorder %v7128_v24, %v7103_v16  ;;  %vm9156_vm1 = vcmp.eq.s32.totalorder %v7151_v29, %v7103_v16 }
 0x12e   : > { %v2277_v47 = vsel %vm9154_vm0, %v7391_v31, 0.0  ;;  %v2278_v48 = vsel %vm9155_vm2, %v7391_v31, 0.0  ;;  %vm9157_vm3 = vcmp.eq.s32.totalorder %v7154_v30, %v7103_v16  ;;  %v2281_v51 = vsel %vm9158_vm14, %v7391_v31, 0.0 }
 0x12f   : > { %v2280_v50 = vsel %vm9157_vm3, %v7391_v31, 0.0  ;;  %v2282_v53 = vsel %vm9159_vm4, %v7391_v31, 0.0  ;;  %v2283_v55 = vsel %vm9160_vm8, %v7391_v31, 0.0  ;;  %v2285_v59 = vsel %vm9163_vm10, %v7391_v31, 0.0 }
 0x130   : > { %711 = vadd.xlane.f32.xlu1 %v709_v56  ;;  %725 = vadd.xlane.f32.xlu0 %v722_v49  ;;  %v2279_v49 = vsel %vm9156_vm1, %v7391_v31, 0.0  ;;  %v7442_v56 = vsub.f32 %v7082_v0, %v7430_v52  ;;  %v2286_v61 = vsel %vm9164_vm5, %v7391_v31, 0.0  ;;  %v2287_v62 = vsel %vm9165_vm11, %v7391_v31, 0.0 }
 0x131   : > { %vm9166_vm0 = vcmp.eq.s32.totalorder %v7226_v46, %v7103_v16 }
 0x132   : > { %9161 = vst [vmem:[#allocation15_spill] sm:$0xff] %v7442_v56  ;;  %v2288_v4 = vsel %vm9166_vm0, %v7391_v31, 0.0 }
 0x134   : > { %737 = vadd.xlane.f32.xlu1 %v734_v57  ;;  %723 = vadd.xlane.f32.xlu0 %v721_v58  ;;  %v9069_v57 = vand.u32 4294901760, %v7442_v56  ;;  %v2284_v58 = vsel %vm9162_vm13, %v7391_v31, 0.0 }
 0x136   : > { %v1565_v60 = vsub.f32 %v7442_v56, %v9069_v57 }
 0x138   : > { %735 = vadd.xlane.f32.xlu1 %v733_v8  ;;  %749 = vadd.xlane.f32.xlu0 %v746_v63  ;;  %v1566_v0 = vand.u32 4294901760, %v1565_v60  ;;  %v9084_v63 = vmov 0.0  }
 0x139   : > { %5036 = vmatprep.mubr.msk.f32.mxu0 %vm9120_vm15, %v9084_v63 }
 0x13a   : > { %5246 = vmatprep.mubr.f32.mxu1 %v1566_v0 }
 0x13c   : > { %761 = vadd.xlane.f32.xlu1 %v758_v9  ;;  %747 = vadd.xlane.f32.xlu0 %v745_v10 }
 0x140   : > { %759 = vadd.xlane.f32.xlu1 %v757_v26  ;;  %773 = vadd.xlane.f32.xlu0 %v770_v15 }
 0x144   : > { %785 = vadd.xlane.f32.xlu1 %v782_v27  ;;  %771 = vadd.xlane.f32.xlu0 %v769_v28 }
 0x148   : > { %783 = vadd.xlane.f32.xlu1 %v781_v39  ;;  %2289 = vadd.xlane.f32.xlu0 %v2273_v36 }
 0x14c   : > { %2291 = vadd.xlane.f32.xlu1 %v2274_v40  ;;  %2293 = vadd.xlane.f32.xlu0 %v2275_v43 }
 0x150   : > { %2295 = vadd.xlane.f32.xlu1 %v2276_v44  ;;  %2297 = vadd.xlane.f32.xlu0 %v2277_v47  ;;  %v9167_v44 = vmov 0 }
 0x154   : > { %2299 = vadd.xlane.f32.xlu1 %v2278_v48  ;;  %2301 = vadd.xlane.f32.xlu0 %v2279_v49  ;;  %v9082_v49 = vmov 1.0|1.0  }
 0x158   : > { %2303 = vadd.xlane.f32.xlu1 %v2280_v50  ;;  %2305 = vadd.xlane.f32.xlu0 %v2281_v51 }
 0x15c   : > { %2307 = vadd.xlane.f32.xlu1 %v2282_v53  ;;  %2309 = vadd.xlane.f32.xlu0 %v2283_v55 }
 0x160   : > { %2311 = vadd.xlane.f32.xlu1 %v2284_v58  ;;  %2313 = vadd.xlane.f32.xlu0 %v2285_v59 }
 0x164   : > { %2315 = vadd.xlane.f32.xlu1 %v2286_v61  ;;  %2317 = vadd.xlane.f32.xlu0 %v2287_v62 }
 0x168   : > { %2319 = vadd.xlane.f32.xlu1 %v2288_v4 }
 0x195   : > { %v606_v5 = vpop.xlane.xlu0 %605 }
 0x196   : > { %v608_v6 = vcvt.f32.s32 %v606_v5 }
 0x198   : > { %v609_v9 = vshll.u32 %v608_v6, 16 }
 0x199   : > { %v618_v7 = vpop.xlane.xlu1 %617  ;;  %v604_v8 = vpop.xlane.xlu0 %603 }
 0x19a   : > { %v620_v10 = vcvt.f32.s32 %v618_v7  ;;  %v607_v11 = vcvt.f32.s32 %v604_v8 }
 0x19c   : > { %v610_v22 = vadd.s32 %v609_v9, %v607_v11  ;;  %v621_v15 = vshll.u32 %v620_v10, 16  ;;  %v9171_v11 = vmov 0 }
 0x19d   : > { %v616_v12 = vpop.xlane.xlu1 %615  ;;  %v630_v13 = vpop.xlane.xlu0 %629 }
 0x19e   : > { %vm791_vm2 = vcmp.eq.s32.totalorder %v610_v22, %v7103_v16  ;;  %v619_v18 = vcvt.f32.s32 %v616_v12  ;;  %v632_v21 = vcvt.f32.s32 %v630_v13 }
 0x19f   : > { %v4324_v25 = vsel %vm791_vm2, 1.0, %v9084_v63 }
 0x1a0   : > { %v622_v26 = vadd.s32 %v621_v15, %v619_v18  ;;  %v633_v35 = vshll.u32 %v632_v21, 16  ;;  %v7473_v40 = vsub.f32 %v4324_v25, %v4324_v25 }
 0x1a1   : > { %v642_v27 = vpop.xlane.xlu1 %641  ;;  %v628_v28 = vpop.xlane.xlu0 %627 }
 0x1a2   : > { %vm792_vm1 = vcmp.eq.s32.totalorder %v622_v26, %v7103_v16  ;;  %v644_v36 = vcvt.f32.s32 %v642_v27  ;;  %v631_v39 = vcvt.f32.s32 %v628_v28  ;;  %v9081_v59 = vand.u32 4294901760, %v7473_v40 }
 0x1a3   : > { %v4325_v43 = vsel %vm792_vm1, 1.0, %v9084_v63  ;;  %vm7476_vm3 = vmpackc.low %vm792_vm1, %vm791_vm2 }
 0x1a4   : > { %v9168_v44 = vsel %vm7476_vm3, 4294967295, %v9167_v44  ;;  %v7480_v47 = vsub.f32 %v4325_v43, %v4325_v43  ;;  %v634_v48 = vadd.s32 %v633_v35, %v631_v39  ;;  %5882 = vmatpush3.bf16.msk.msra.mxu0 %vm7476_vm3, %v9082_v49  ;;  %6025 = vmatprep.subr.msk.bf16.mxu1 %vm7476_vm3, %v9082_v49  ;;  %v645_v53 = vshll.u32 %v644_v36, 16 }
 0x1a5   : > { %9169 = vst [vmem:[#allocation16_spill] sm:$0xff] %v9168_v44  ;;  %v640_v50 = vpop.xlane.xlu1 %639  ;;  %6027 = vmatpush3.bf16.msk.msra.mxu1 %vm7476_vm3, %v9082_v49  ;;  %v654_v51 = vpop.xlane.xlu0 %653  ;;  %5883 = vmatprep.subr.bf16.mxu0 %v9086_v32 }
 0x1a6   : > { %vm793_vm14 = vcmp.eq.s32.totalorder %v634_v48, %v7103_v16  ;;  %v643_v55 = vcvt.f32.s32 %v640_v50  ;;  %v656_v58 = vcvt.f32.s32 %v654_v51  ;;  %v9078_v60 = vand.u32 4294901760, %v7480_v47 }
 0x1a7   : > { %v4326_v0 = vsel %vm793_vm14, 1.0, %v9084_v63 }
 0x1a8   : > { %v646_v61 = vadd.s32 %v645_v53, %v643_v55  ;;  %v657_v62 = vshll.u32 %v656_v58, 16  ;;  %v7502_v6 = vpack.c.bf16 %v9078_v60, %v9081_v59  ;;  %v7505_v9 = vsub.f32 %v4326_v0, %v4326_v0 }
 0x1a9   : > { %v666_v4 = vpop.xlane.xlu1 %665  ;;  %v652_v5 = vpop.xlane.xlu0 %651  ;;  %v9175_v58 = vmov 0 }
 0x1aa   : > { %9170 = vst [vmem:[#allocation17_spill] sm:$0xff] %v7502_v6  ;;  %vm794_vm4 = vcmp.eq.s32.totalorder %v646_v61, %v7103_v16  ;;  %v668_v7 = vcvt.f32.s32 %v666_v4  ;;  %v655_v8 = vcvt.f32.s32 %v652_v5  ;;  %v9077_v26 = vand.u32 4294901760, %v7505_v9 }
 0x1ab   : > { %v4327_v10 = vsel %vm794_vm4, 1.0, %v9084_v63  ;;  %vm7510_vm8 = vmpackc.low %vm794_vm4, %vm793_vm14  ;;  %v9200_v6 = vand.u32 4294901760, %v7473_v40 }
 0x1ac   : > { %v9172_v11 = vsel %vm7510_vm8, 4294967295, %v9171_v11  ;;  %v7514_v22 = vsub.f32 %v4327_v10, %v4327_v10  ;;  %v658_v12 = vadd.s32 %v657_v62, %v655_v8  ;;  %5885 = vmatpush3.bf16.msk.msra.mxu0 %vm7510_vm8, %v9082_v49  ;;  %6029 = vmatprep.subr.msk.bf16.mxu1 %vm7510_vm8, %v9082_v49  ;;  %v669_v18 = vshll.u32 %v668_v7, 16 }
 0x1ad   : > { %9173 = vst [vmem:[#allocation18_spill] sm:$0xff] %v9172_v11  ;;  %v664_v13 = vpop.xlane.xlu1 %663  ;;  %6031 = vmatpush3.bf16.msk.msra.mxu1 %vm7510_vm8, %v9082_v49  ;;  %v678_v15 = vpop.xlane.xlu0 %677  ;;  %5886 = vmatprep.subr.bf16.mxu0 %v9086_v32 }
 0x1ae   : > { %vm795_vm13 = vcmp.eq.s32.totalorder %v658_v12, %v7103_v16  ;;  %v667_v21 = vcvt.f32.s32 %v664_v13  ;;  %v680_v25 = vcvt.f32.s32 %v678_v15  ;;  %v9076_v27 = vand.u32 4294901760, %v7514_v22 }
 0x1af   : > { %v4328_v28 = vsel %vm795_vm13, 1.0, %v9084_v63 }
 0x1b0   : > { %v670_v35 = vadd.s32 %v669_v18, %v667_v21  ;;  %v681_v36 = vshll.u32 %v680_v25, 16  ;;  %v7536_v48 = vpack.c.bf16 %v9076_v27, %v9077_v26  ;;  %v7539_v53 = vsub.f32 %v4328_v28, %v4328_v28 }
 0x1b1   : > { %v690_v39 = vpop.xlane.xlu1 %689  ;;  %v676_v43 = vpop.xlane.xlu0 %675 }
 0x1b2   : > { %9174 = vst [vmem:[#allocation19_spill] sm:$0xff] %v7536_v48  ;;  %vm796_vm10 = vcmp.eq.s32.totalorder %v670_v35, %v7103_v16  ;;  %v692_v50 = vcvt.f32.s32 %v690_v39  ;;  %v679_v51 = vcvt.f32.s32 %v676_v43  ;;  %v9073_v10 = vand.u32 4294901760, %v7539_v53 }
 0x1b3   : > { %v4329_v55 = vsel %vm796_vm10, 1.0, %v9084_v63  ;;  %vm7544_vm5 = vmpackc.low %vm796_vm10, %vm795_vm13  ;;  %v9213_v44 = vand.u32 4294901760, %v7539_v53 }
 0x1b4   : > { %v9176_v58 = vsel %vm7544_vm5, 4294967295, %v9175_v58  ;;  %v7549_v0 = vsub.f32 %v4329_v55, %v4329_v55  ;;  %v682_v61 = vadd.s32 %v681_v36, %v679_v51  ;;  %5888 = vmatpush3.bf16.msk.msra.mxu0 %vm7544_vm5, %v9082_v49  ;;  %6033 = vmatprep.subr.msk.bf16.mxu1 %vm7544_vm5, %v9082_v49  ;;  %v693_v5 = vshll.u32 %v692_v50, 16 }
 0x1b5   : > { %9177 = vst [vmem:[#allocation20_spill] sm:$0xff] %v9176_v58  ;;  %v688_v62 = vpop.xlane.xlu1 %687  ;;  %6035 = vmatpush3.bf16.msk.msra.mxu1 %vm7544_vm5, %v9082_v49  ;;  %v702_v4 = vpop.xlane.xlu0 %701  ;;  %5889 = vmatprep.subr.bf16.mxu0 %v9086_v32  ;;  %v9179_v50 = vmov 0  ;;  %v7780_v56 = vsub.f32 %v7539_v53, %v9213_v44 }
 0x1b6   : > { %vm797_vm11 = vcmp.eq.s32.totalorder %v682_v61, %v7103_v16  ;;  %v691_v7 = vcvt.f32.s32 %v688_v62  ;;  %v704_v8 = vcvt.f32.s32 %v702_v4  ;;  %v9070_v12 = vand.u32 4294901760, %v7549_v0 }
 0x1b7   : > { %v4330_v13 = vsel %vm797_vm11, 1.0, %v9084_v63 }
 0x1b8   : > { %v694_v15 = vadd.s32 %v693_v5, %v691_v7  ;;  %v705_v18 = vshll.u32 %v704_v8, 16  ;;  %v7572_v28 = vpack.c.bf16 %v9070_v12, %v9073_v10  ;;  %v7575_v39 = vsub.f32 %v4330_v13, %v4330_v13 }
 0x1b9   : > { %v714_v21 = vpop.xlane.xlu1 %713  ;;  %v700_v25 = vpop.xlane.xlu0 %699 }
 0x1ba   : > { %9178 = vst [vmem:[#allocation21_spill] sm:$0xff] %v7572_v28  ;;  %vm798_vm0 = vcmp.eq.s32.totalorder %v694_v15, %v7103_v16  ;;  %v716_v35 = vcvt.f32.s32 %v714_v21  ;;  %v703_v36 = vcvt.f32.s32 %v700_v25  ;;  %v9072_v8 = vand.u32 4294901760, %v7575_v39 }
 0x1bb   : > { %v4331_v43 = vsel %vm798_vm0, 1.0, %v9084_v63  ;;  %vm7580_vm2 = vmpackc.low %vm798_vm0, %vm797_vm11 }
 0x1bc   : > { %v9180_v50 = vsel %vm7580_vm2, 4294967295, %v9179_v50  ;;  %v7586_v51 = vsub.f32 %v4331_v43, %v4331_v43  ;;  %v706_v55 = vadd.s32 %v705_v18, %v703_v36  ;;  %5891 = vmatpush3.bf16.msk.msra.mxu0 %vm7580_vm2, %v9082_v49  ;;  %6037 = vmatprep.subr.msk.bf16.mxu1 %vm7580_vm2, %v9082_v49  ;;  %v717_v4 = vshll.u32 %v716_v35, 16  ;;  %v402_v36 = vld [vmem:[%s389_s20] sm:$0x7]  ;;  %s4066_s20 = scalar_lea.sflag [#allocation4], %s7060_s21 }
 0x1bd   : > { %9181 = vst [vmem:[#allocation22_spill] sm:$0xff] %v9180_v50  ;;  %v712_v62 = vpop.xlane.xlu1 %711  ;;  %6039 = vmatpush3.bf16.msk.msra.mxu1 %vm7580_vm2, %v9082_v49  ;;  %v726_v61 = vpop.xlane.xlu0 %725  ;;  %5892 = vmatprep.subr.bf16.mxu0 %v9086_v32 }
 0x1be   : > { %vm799_vm1 = vcmp.eq.s32.totalorder %v706_v55, %v7103_v16  ;;  %v715_v5 = vcvt.f32.s32 %v712_v62  ;;  %v728_v7 = vcvt.f32.s32 %v726_v61  ;;  %v9071_v13 = vand.u32 4294901760, %v7586_v51 }
 0x1bf   : > { %v4332_v15 = vsel %vm799_vm1, 1.0, %v9084_v63 }
 0x1c0   : > { %v718_v18 = vadd.s32 %v717_v4, %v715_v5  ;;  %v729_v21 = vshll.u32 %v728_v7, 16  ;;  %v7612_v43 = vpack.c.bf16 %v9071_v13, %v9072_v8  ;;  %v7615_v57 = vsub.f32 %v4332_v15, %v4332_v15 }
 0x1c1   : > { %v738_v25 = vpop.xlane.xlu1 %737  ;;  %v724_v35 = vpop.xlane.xlu0 %723  ;;  %v9183_v4 = vmov 0  ;;  %v7632_v15 = vand.u32 4294901760, %v402_v36 }
 0x1c2   : > { %9182 = vst [vmem:[#allocation23_spill] sm:$0xff] %v7612_v43  ;;  %vm800_vm14 = vcmp.eq.s32.totalorder %v718_v18, %v7103_v16  ;;  %v740_v62 = vcvt.f32.s32 %v738_v25  ;;  %v727_v61 = vcvt.f32.s32 %v724_v35 }
 0x1c3   : > { %v4333_v12 = vsel %vm800_vm14, 1.0, %v9084_v63  ;;  %vm7620_vm4 = vmpackc.low %vm800_vm14, %vm799_vm1  ;;  %v7648_v27 = vsub.f32 %v402_v36, %v7632_v15 }
 0x1c4   : > { %v9184_v4 = vsel %vm7620_vm4, 4294967295, %v9183_v4  ;;  %v7624_v5 = vsub.f32 %v4333_v12, %v4333_v12  ;;  %v730_v7 = vadd.s32 %v729_v21, %v727_v61  ;;  %5894 = vmatpush3.bf16.msk.msra.mxu0 %vm7620_vm4, %v9082_v49  ;;  %6041 = vmatprep.subr.msk.bf16.mxu1 %vm7620_vm4, %v9082_v49  ;;  %v7639_v12 = vand.u32 4294901760, %v7085_v1 }
 0x1c5   : > { %9185 = vst [vmem:[#allocation24_spill] sm:$0xff] %v9184_v4  ;;  %v736_v18 = vpop.xlane.xlu1 %735  ;;  %6043 = vmatpush3.bf16.msk.msra.mxu1 %vm7620_vm4, %v9082_v49  ;;  %v750_v55 = vpop.xlane.xlu0 %749  ;;  %5895 = vmatprep.subr.bf16.mxu0 %v9086_v32  ;;  %v741_v21 = vshll.u32 %v740_v62, 16  ;;  %v9079_v61 = vand.u32 4294901760, %v7615_v57  ;;  %9186 = vst [vmem:[#allocation25_spill] sm:$0xff] %v7648_v27  ;;  %v9195_v43 = vand.u32 4294901760, %v7648_v27 }
 0x1c6   : > { %vm801_vm13 = vcmp.eq.s32.totalorder %v730_v7, %v7103_v16  ;;  %v739_v25 = vcvt.f32.s32 %v736_v18  ;;  %v752_v35 = vcvt.f32.s32 %v750_v55  ;;  %v9080_v13 = vand.u32 4294901760, %v7624_v5 }
 0x1c7   : > { %v4334_v8 = vsel %vm801_vm13, 1.0, %v9084_v63  ;;  %v7652_v62 = vsub.f32 %v7085_v1, %v7639_v12  ;;  %v7655_v18 = vand.u32 4294901760, %v7088_v2  ;;  %v7658_v55 = vand.u32 4294901760, %v7091_v3 }
 0x1c8   : > { %v742_v10 = vadd.s32 %v741_v21, %v739_v25  ;;  %v753_v54 = vshll.u32 %v752_v35, 16  ;;  %v7664_v21 = vpack.c.bf16 %v9080_v13, %v9079_v61  ;;  %v7667_v1 = vsub.f32 %v4334_v8, %v4334_v8  ;;  %v6677_v8 = vld [vmem:[%s7067_s9 + $0x10] sm:$0xff] }
 0x1c9   : > { %v762_v26 = vpop.xlane.xlu1 %761  ;;  %v748_v60 = vpop.xlane.xlu0 %747  ;;  %9187 = vst [vmem:[#allocation26_spill] sm:$0xff] %v7652_v62  ;;  %v9189_v3 = vmov 0  ;;  %v7692_v7 = vsub.f32 %v6677_v8, %v7655_v18 }
 0x1ca   : > { %9188 = vst [vmem:[#allocation27_spill] sm:$0xff] %v7664_v21  ;;  %vm802_vm10 = vcmp.eq.s32.totalorder %v742_v10, %v7103_v16  ;;  %v764_v36 = vcvt.f32.s32 %v762_v26  ;;  %v751_v25 = vcvt.f32.s32 %v748_v60  ;;  %v9197_v48 = vand.u32 4294901760, %v7667_v1 }
 0x1cb   : > { %v4335_v2 = vsel %vm802_vm10, 1.0, %v9084_v63  ;;  %vm7672_vm11 = vmpackc.low %vm802_vm10, %vm801_vm13  ;;  %9192 = vst [vmem:[#allocation29_spill] sm:$0xff] %v7692_v7  ;;  %v9209_v4 = vand.u32 4294901760, %v7692_v7 }
 0x1cc   : > { %v9190_v3 = vsel %vm7672_vm11, 4294967295, %v9189_v3  ;;  %v7676_v35 = vsub.f32 %v4335_v2, %v4335_v2  ;;  %v754_v61 = vadd.s32 %v753_v54, %v751_v25  ;;  %5897 = vmatpush3.bf16.msk.msra.mxu0 %vm7672_vm11, %v9082_v49  ;;  %6045 = vmatprep.subr.msk.bf16.mxu1 %vm7672_vm11, %v9082_v49  ;;  %v6678_v25 = vld [vmem:[%s7067_s9 + $0x18] sm:$0xff]  ;;  %v765_v13 = vshll.u32 %v764_v36, 16  ;;  %s378_s9 = scalar_lea.vmem [#allocation7], %s7063_s16 }
 0x1cd   : > { %9191 = vst [vmem:[#allocation28_spill] sm:$0xff] %v9190_v3  ;;  %v760_v26 = vpop.xlane.xlu1 %759  ;;  %6047 = vmatpush3.bf16.msk.msra.mxu1 %vm7672_vm11, %v9082_v49  ;;  %v774_v10 = vpop.xlane.xlu0 %773  ;;  %5898 = vmatprep.subr.bf16.mxu0 %v9086_v32  ;;  %v7696_v2 = vsub.f32 %v6678_v25, %v7658_v55  ;;  %v9194_v32 = vmov 0.0   ;;  %v7707_v25 = vsub.f32 %v7648_v27, %v9195_v43  ;;  %v9201_v49 = vmov 0  ;;  %s4090_s10 = sshll.u32 %s378_s9, 4  ;;  %s8937_s10 = int_to_ptr.vmem [resolvable:$true] %s4090_s10 }
 0x1ce   : > { %vm803_vm0 = vcmp.eq.s32.totalorder %v754_v61, %v7103_v16  ;;  %v763_v59 = vcvt.f32.s32 %v760_v26  ;;  %v776_v60 = vcvt.f32.s32 %v774_v10  ;;  %v9196_v26 = vand.u32 4294901760, %v7652_v62  ;;  %s6743_s2 = scalar_lea.vmem %s8937_s10, 512 }
 0x1cf   : > { %9193 = vst [vmem:[#allocation30_spill] sm:$0xff] %v7696_v2  ;;  %v4336_v54 = vsel %vm803_vm0, 1.0, %v9194_v32  ;;  %v934_v3 = vsub.f32 %v7473_v40, %v9200_v6  ;;  %v9207_v61 = vand.u32 4294901760, %v7514_v22  ;;  %v7761_v50 = vsub.f32 %v7692_v7, %v9209_v4  ;;  %p6744_p1 = scmp.ne.s32.totalorder %s8937_s10, %s6743_s2 }
 0x1d0   : > { %v766_v21 = vadd.s32 %v765_v13, %v763_v59  ;;  %v777_v8 = vshll.u32 %v776_v60, 16  ;;  %v7712_v10 = vsub.f32 %v7652_v62, %v9196_v26  ;;  %v9198_v59 = vand.u32 4294901760, %v7676_v35 }
 0x1d1   : > { %v786_v36 = vpop.xlane.xlu1 %785  ;;  %v772_v28 = vpop.xlane.xlu0 %771  ;;  %v7726_v26 = vsub.f32 %v4336_v54, %v4336_v54  ;;  %v9206_v54 = vmov 1.0|1.0   ;;  %v9210_v58 = vand.u32 4294901760, %v7696_v2  ;;  %v9212_v27 = vmov 0   ;;  %p6745_p10 = pnand %p6744_p1, %p9311_p12 }
 0x1d2   : > { %v7720_v13 = vpack.c.bf16 %v9198_v59, %v9197_v48  ;;  %vm804_vm1 = vcmp.eq.s32.totalorder %v766_v21, %v7103_v16  ;;  %v788_v43 = vcvt.f32.s32 %v786_v36  ;;  %v775_v60 = vcvt.f32.s32 %v772_v28 }
 0x1d3   : > { %v4337_v63 = vsel %vm804_vm1, 1.0, %v9194_v32  ;;  %vm7731_vm14 = vmpackc.low %vm804_vm1, %vm803_vm0  ;;  %v9204_v48 = vand.u32 4294901760, %v7480_v47  ;;  %v9205_v28 = vand.u32 4294901760, %v7505_v9  ;;  %vm9211_vm1 = vcmp.lt.s32.totalorder %v7103_v16, %v7101_v14  ;;  %p6746_p5 = pneg %p6745_p10 }
 0x1d4   : > { %9199 = vst [vmem:[#allocation31_spill] sm:$0xff] %v7720_v13  ;;  %v9202_v49 = vsel %vm7731_vm14, 4294967295, %v9201_v49  ;;  %v7741_v59 = vsub.f32 %v4337_v63, %v4337_v63  ;;  %v778_v6 = vadd.s32 %v777_v8, %v775_v60  ;;  %5900 = vmatpush3.bf16.msk.msra.mxu0 %vm7731_vm14, %v9206_v54  ;;  %6049 = vmatprep.subr.msk.bf16.mxu1 %vm7731_vm14, %v9206_v54  ;;  %v924_v8 = vand.u32 4294901760, %v7707_v25 }
 0x1d5   : > { %9203 = vst [vmem:[#allocation32_spill] sm:$0xff] %v9202_v49  ;;  %v941_v21 = vsub.f32 %v7480_v47, %v9204_v48  ;;  %v948_v36 = vsub.f32 %v7505_v9, %v9205_v28  ;;  %v955_v13 = vsub.f32 %v7514_v22, %v9207_v61  ;;  %v784_v48 = vpop.xlane.xlu1 %783  ;;  %6051 = vmatpush3.bf16.msk.msra.mxu1 %vm7731_vm14, %v9206_v54  ;;  %v2290_v63 = vpop.xlane.xlu0 %2289  ;;  %v9208_v28 = vmov 0.0|0.0  }
 0x1d6   : > { %5901 = vmatprep.subr.bf16.mxu0 %v9208_v28  ;;  %v1576_v60 = vand.u32 4294901760, %v7712_v10  ;;  %v7766_v61 = vsub.f32 %v7696_v2, %v9210_v58  ;;  %v789_v11 = vshll.u32 %v788_v43, 16  ;;  %v787_v49 = vcvt.f32.s32 %v784_v48 }
 0x1d7   : > { %vm2321_vm13 = vcmp.gt.f32.partialorder %v7391_v31, %v2290_v63  ;;  %vm2337_vm10 = vcmp.eq.f32.partialorder %v7391_v31, %v2290_v63  ;;  %vm805_vm0 = vcmp.eq.s32.totalorder %v778_v6, %v7103_v16  ;;  %v935_v25 = vand.u32 4294901760, %v934_v3 }
 0x1d8   : > { %vm2353_vm6 = vmand %vm2337_vm10, %vm9211_vm1  ;;  %v9122_v4 = vand.u32 4294901760, %v7726_v26  ;;  %v9123_v10 = vand.u32 4294901760, %v7741_v59  ;;  %v790_v7 = vadd.s32 %v789_v11, %v787_v49  ;;  %v942_v58 = vand.u32 4294901760, %v941_v21 }
 0x1d9   : > { %vm2369_vm9 = vmor %vm2321_vm13, %vm2353_vm6  ;;  %v949_v43 = vand.u32 4294901760, %v948_v36  ;;  %v956_v48 = vand.u32 4294901760, %v955_v13  ;;  %v2292_v2 = vpop.xlane.xlu1 %2291  ;;  %v2294_v62 = vpop.xlane.xlu0 %2293  ;;  %v9214_v14 = vand.u32 4294901760, %v7549_v0  ;;  %v4338_v11 = vsel %vm805_vm0, 1.0, %v9194_v32 }
 0x1da   : > { %v2385_v63 = vsel %vm2369_vm9, 1, %v9212_v27  ;;  %v7791_v49 = vpack.c.bf16 %v9123_v10, %v9122_v4  ;;  %vm806_vm9 = vcmp.eq.s32.totalorder %v790_v7, %v7103_v16  ;;  %vm2322_vm6 = vcmp.gt.f32.partialorder %v7391_v31, %v2292_v2 }
 0x1db   : > { %v7785_v3 = vsub.f32 %v7549_v0, %v9214_v14  ;;  %vm2338_vm13 = vcmp.eq.f32.partialorder %v7391_v31, %v2292_v2  ;;  %v4339_v44 = vsel %vm806_vm9, 1.0, %v9194_v32  ;;  %vm7802_vm10 = vmpackc.low %vm806_vm9, %vm805_vm0  ;;  %v9216_v13 = vmov 0 }
 0x1dc   : > { %9215 = vst [vmem:[#allocation33_spill] sm:$0xff] %v7791_v49  ;;  %v9217_v13 = vsel %vm7802_vm10, 4294967295, %v9216_v13  ;;  %vm2339_vm1 = vcmp.eq.f32.partialorder %v7391_v31, %v2294_v62  ;;  %v2402_v21 = vshrl.u32 %v2385_v63, 16  ;;  %v2401_v36 = vand.u32 65535, %v2385_v63  ;;  %vm2354_vm15 = vmand %vm2338_vm13, %vm536_vm7  ;;  %5903 = vmatpush3.bf16.msk.msra.mxu0 %vm7802_vm10, %v9206_v54  ;;  %6053 = vmatprep.subr.msk.bf16.mxu1 %vm7802_vm10, %v9206_v54 }
 0x1dd   : > { %vm2323_vm0 = vcmp.gt.f32.partialorder %v7391_v31, %v2294_v62  ;;  %v5905_v7 = vpack.c.bf16 %v942_v58, %v935_v25  ;;  %v1586_v6 = vand.u32 4294901760, %v7761_v50  ;;  %v1596_v14 = vand.u32 4294901760, %v7766_v61  ;;  %vm2370_vm7 = vmor %vm2322_vm6, %vm2354_vm15  ;;  %6055 = vmatpush3.bf16.msk.msra.mxu1 %vm7802_vm10, %v9206_v54  ;;  %5904 = vmatprep.subr.bf16.mxu0 %v9208_v28  ;;  %v2296_v4 = vpop.xlane.xlu1 %2295  ;;  %v2298_v49 = vpop.xlane.xlu0 %2297 }
 0x1de   : > { %v7819_v63 = vsub.f32 %v4339_v44, %v4339_v44  ;;  %v2404_v19 = vcvt.s32.f32 %v2402_v21  ;;  %v5908_v10 = vpack.c.bf16 %v956_v48, %v949_v43  ;;  %v963_v25 = vand.u32 4294901760, %v7780_v56 }
 0x1df   : > { %v7828_v50 = vsub.f32 %v4338_v11, %v4338_v11  ;;  %vm9218_vm9 = vcmp.lt.s32.totalorder %v7103_v16, %v7106_v17  ;;  %6057 = vmatprep.subr.bf16.mxu1 %v5905_v7  ;;  %vm2340_vm13 = vcmp.eq.f32.partialorder %v7391_v31, %v2296_v4  ;;  %v2386_v2 = vsel %vm2370_vm7, 1, %v9212_v27  ;;  %5037 = vmatmul.mubr.f32.vlgmr.msra.gmra.mrb[0].mxu0 %v924_v8 }
 0x1e0   : > { %vm2355_vm15 = vmand %vm2339_vm1, %vm9218_vm9  ;;  %2407 = vadd.xlane.f32.xlu0 %v2404_v19  ;;  %v2414_v56 = vshrl.u32 %v2386_v2, 16  ;;  %v2403_v61 = vcvt.s32.f32 %v2401_v36  ;;  %vm2341_vm10 = vcmp.eq.f32.partialorder %v7391_v31, %v2298_v49  ;;  %v970_v17 = vand.u32 4294901760, %v7785_v3  ;;  %5906 = vmatpush3.bf16.msra.mxu0 %v5905_v7 }
 0x1e1   : > { %vm2371_vm12 = vmor %vm2323_vm0, %vm2355_vm15  ;;  %vm9219_vm1 = vcmp.lt.s32.totalorder %v7103_v16, %v7112_v20  ;;  %5247 = vmatmul.mubr.f32.vlgmr.msra.gmra.mrb[0].mxu1 %v1576_v60  ;;  %vm2325_vm6 = vcmp.gt.f32.partialorder %v7391_v31, %v2298_v49  ;;  %v9220_v62 = vand.u32 4294901760, %v7575_v39  ;;  %v9221_v43 = vand.u32 4294901760, %v7586_v51  ;;  %5907 = vmatprep.subr.bf16.mxu0 %v9208_v28  ;;  %v2300_v11 = vpop.xlane.xlu1 %2299  ;;  %v2302_v44 = vpop.xlane.xlu0 %2301 }
 0x1e2   : > { %vm2356_vm9 = vmand %vm2340_vm13, %vm9219_vm1  ;;  %v2387_v58 = vsel %vm2371_vm12, 1, %v9212_v27  ;;  %vm9222_vm0 = vcmp.gt.f32.partialorder %v7391_v31, %v2296_v4  ;;  %6059 = vmatpush3.bf16.msra.mxu1 %v5905_v7  ;;  %v2416_v20 = vcvt.s32.f32 %v2414_v56  ;;  %v2413_v60 = vand.u32 65535, %v2386_v2  ;;  %5249 = vmatprep.mubr.f32.mxu1 %v1586_v6 }
 0x1e3   : > { %v976_v8 = vsub.f32 %v7575_v39, %v9220_v62  ;;  %v983_v48 = vsub.f32 %v7586_v51, %v9221_v43  ;;  %vm2372_vm7 = vmor %vm9222_vm0, %vm2356_vm9  ;;  %v2426_v3 = vshrl.u32 %v2387_v58, 16  ;;  %v1038_v21 = vand.u32 4294901760, %v7819_v63  ;;  %6061 = vmatprep.subr.bf16.mxu1 %v5908_v10 }
 0x1e4   : > { %vm9223_vm12 = vcmp.lt.s32.totalorder %v7103_v16, %v7125_v23  ;;  %vm2326_vm13 = vcmp.gt.f32.partialorder %v7391_v31, %v2300_v11  ;;  %vm2342_vm1 = vcmp.eq.f32.partialorder %v7391_v31, %v2300_v11  ;;  %v7865_v4 = vsel %vm2372_vm7, 1, %v9212_v27  ;;  %2419 = vadd.xlane.f32.xlu1 %v2416_v20  ;;  %2405 = vadd.xlane.f32.xlu0 %v2403_v61 }
 0x1e5   : > { %vm2357_vm15 = vmand %vm2341_vm10, %vm9223_vm12  ;;  %v1031_v36 = vand.u32 4294901760, %v7828_v50  ;;  %v2428_v7 = vcvt.s32.f32 %v2426_v3  ;;  %v2438_v23 = vshrl.u32 %v7865_v4, 16  ;;  %v2425_v19 = vand.u32 65535, %v2387_v58  ;;  %5909 = vmatpush3.bf16.msra.mxu0 %v5908_v10  ;;  %5250 = vmatmul.mubr.f32.gmra.mrb[2].mxu1 %v1596_v14 }
 0x1e6   : > { %vm2373_vm9 = vmor %vm2325_vm6, %vm2357_vm15  ;;  %vm2343_vm10 = vcmp.eq.f32.partialorder %v7391_v31, %v2302_v44  ;;  %v5911_v2 = vpack.c.bf16 %v970_v17, %v963_v25  ;;  %vm9224_vm0 = vcmp.lt.s32.totalorder %v7103_v16, %v7128_v24  ;;  %v984_v56 = vand.u32 4294901760, %v983_v48  ;;  %6063 = vmatpush3.bf16.msra.mxu1 %v5908_v10  ;;  %5910 = vmatprep.subr.bf16.mxu0 %v9208_v28  ;;  %v2304_v24 = vpop.xlane.xlu1 %2303 }
 0x1e7   : > { %vm2358_vm7 = vmand %vm2342_vm1, %vm9224_vm0  ;;  %v9225_v6 = vand.u32 4294901760, %v7624_v5  ;;  %v2389_v49 = vsel %vm2373_vm9, 1, %v9212_v27  ;;  %v2415_v62 = vcvt.s32.f32 %v2413_v60  ;;  %v7890_v17 = vpack.c.bf16 %v1038_v21, %v1031_v36  ;;  %5284 = vmatprep.mubr.f32.mxu1 %v7430_v52 }
 0x1e8   : > { %vm7882_vm6 = vmor %vm2326_vm13, %vm2358_vm7  ;;  %6065 = vmatprep.subr.bf16.mxu1 %v5911_v2  ;;  %v977_v58 = vand.u32 4294901760, %v976_v8  ;;  %vm2327_vm12 = vcmp.gt.f32.partialorder %v7391_v31, %v2302_v44  ;;  %vm9228_vm15 = vcmp.lt.s32.totalorder %v7103_v16, %v7151_v29  ;;  %v9231_v14 = vand.u32 4294901760, %v7615_v57  ;;  %2431 = vadd.xlane.f32.xlu0 %v2428_v7 }
 0x1e9   : > { %v997_v61 = vsub.f32 %v7624_v5, %v9225_v6  ;;  %vm7898_vm13 = vmand %vm2343_vm10, %vm9228_vm15  ;;  %vm9232_vm1 = vmmov 0   ;;  %2417 = vadd.xlane.f32.xlu1 %v2415_v62  ;;  %v2440_v8 = vcvt.s32.f32 %v2438_v23  ;;  %v2427_v48 = vcvt.s32.f32 %v2425_v19  ;;  %5912 = vmatpush3.bf16.msra.mxu0 %v5911_v2 }
 0x1ea   : > { %v990_v43 = vsub.f32 %v7615_v57, %v9231_v14  ;;  %5071 = vmatprep.mubr.msk.f32.mxu0 %vm9232_vm1, %v9194_v32  ;;  %v2450_v20 = vshrl.u32 %v2389_v49, 16  ;;  %vm2344_vm9 = vcmp.eq.f32.partialorder %v7391_v31, %v2304_v24  ;;  %v5914_v29 = vpack.c.bf16 %v984_v56, %v977_v58  ;;  %v2306_v14 = vpop.xlane.xlu0 %2305  ;;  %6067 = vmatpush3.bf16.msra.mxu1 %v5911_v2  ;;  %vm7922_vm10 = vmor %vm2327_vm12, %vm7898_vm13 }
 0x1eb   : > { %v998_v60 = vand.u32 4294901760, %v997_v61  ;;  %v7911_v3 = vsel %vm7882_vm6, 1, %v9212_v27  ;;  %v9233_v11 = vand.u32 4294901760, %v7676_v35  ;;  %5913 = vmatprep.subr.bf16.mxu0 %v9208_v28  ;;  %v2437_v23 = vand.u32 65535, %v7865_v4 }
 0x1ec   : > { %6069 = vmatprep.subr.bf16.mxu1 %v5914_v29  ;;  %v991_v19 = vand.u32 4294901760, %v990_v43  ;;  %vm2328_vm0 = vcmp.gt.f32.partialorder %v7391_v31, %v2304_v24  ;;  %vm9236_vm7 = vcmp.lt.s32.totalorder %v7103_v16, %v7154_v30  ;;  %v9239_v44 = vand.u32 4294901760, %v7667_v1  ;;  %2429 = vadd.xlane.f32.xlu0 %v2427_v48 }
 0x1ed   : > { %v1011_v6 = vsub.f32 %v7676_v35, %v9233_v11  ;;  %vm7933_vm6 = vmand %vm2344_vm9, %vm9236_vm7  ;;  %2443 = vadd.xlane.f32.xlu1 %v2440_v8  ;;  %v2452_v4 = vcvt.s32.f32 %v2450_v20  ;;  %v2462_v61 = vshrl.u32 %v7911_v3, 16  ;;  %v2449_v62 = vand.u32 65535, %v2389_v49  ;;  %5915 = vmatpush3.bf16.msra.mxu0 %v5914_v29  ;;  %v2308_v11 = vpop.xlane.xlu1 %2307 }
 0x1ee   : > { %v1004_v56 = vsub.f32 %v7667_v1, %v9239_v44  ;;  %vm2345_vm12 = vcmp.eq.f32.partialorder %v7391_v31, %v2306_v14  ;;  %v5917_v30 = vpack.c.bf16 %v998_v60, %v991_v19  ;;  %v9240_v58 = vand.u32 4294901760, %v7741_v59  ;;  %6071 = vmatpush3.bf16.msra.mxu1 %v5914_v29  ;;  %5916 = vmatprep.subr.bf16.mxu0 %v9208_v28  ;;  %vm2376_vm15 = vmor %vm2328_vm0, %vm7933_vm6  ;;  %v2310_v2 = vpop.xlane.xlu0 %2309 }
 0x1ef   : > { %v1012_v25 = vand.u32 4294901760, %v1011_v6  ;;  %v2391_v43 = vsel %vm7922_vm10, 1, %v9212_v27  ;;  %v2439_v8 = vcvt.s32.f32 %v2437_v23  ;;  %vm2329_vm13 = vcmp.gt.f32.partialorder %v7391_v31, %v2306_v14 }
 0x1f0   : > { %v1025_v10 = vsub.f32 %v7741_v59, %v9240_v58  ;;  %6073 = vmatprep.subr.bf16.mxu1 %v5917_v30  ;;  %v1005_v49 = vand.u32 4294901760, %v1004_v56  ;;  %vm9241_vm9 = vcmp.lt.s32.totalorder %v7103_v16, %v7169_v33  ;;  %v9244_v20 = vand.u32 4294901760, %v7726_v26  ;;  %2455 = vadd.xlane.f32.xlu0 %v2452_v4 }
 0x1f1   : > { %vm7957_vm7 = vmand %vm2345_vm12, %vm9241_vm9  ;;  %2441 = vadd.xlane.f32.xlu1 %v2439_v8  ;;  %v2464_v60 = vcvt.s32.f32 %v2462_v61  ;;  %v2451_v24 = vcvt.s32.f32 %v2449_v62  ;;  %v2474_v6 = vshrl.u32 %v2391_v43, 16  ;;  %vm2346_vm10 = vcmp.eq.f32.partialorder %v7391_v31, %v2308_v11  ;;  %5918 = vmatpush3.bf16.msra.mxu0 %v5917_v30  ;;  %v2312_v58 = vpop.xlane.xlu1 %2311 }
 0x1f2   : > { %v1018_v29 = vsub.f32 %v7726_v26, %v9244_v20  ;;  %v5920_v7 = vpack.c.bf16 %v1012_v25, %v1005_v49  ;;  %v1026_v23 = vand.u32 4294901760, %v1025_v10  ;;  %v2392_v33 = vsel %vm2376_vm15, 1, %v9212_v27  ;;  %6075 = vmatpush3.bf16.msra.mxu1 %v5917_v30  ;;  %5919 = vmatprep.subr.bf16.mxu0 %v9208_v28  ;;  %vm7974_vm0 = vmor %vm2329_vm13, %vm7957_vm7  ;;  %v2314_v20 = vpop.xlane.xlu0 %2313 }
 0x1f3   : > { %v1039_v19 = vsub.f32 %v7819_v63, %v1038_v21  ;;  %v2461_v56 = vand.u32 65535, %v7911_v3  ;;  %vm2330_vm6 = vcmp.gt.f32.partialorder %v7391_v31, %v2308_v11  ;;  %vm9247_vm12 = vcmp.lt.s32.totalorder %v7103_v16, %v7172_v34 }
 0x1f4   : > { %6077 = vmatprep.subr.bf16.mxu1 %v5920_v7  ;;  %v1019_v4 = vand.u32 4294901760, %v1018_v29  ;;  %vm7983_vm15 = vmand %vm2346_vm10, %vm9247_vm12  ;;  %v1032_v14 = vsub.f32 %v7828_v50, %v1031_v36  ;;  %2453 = vadd.xlane.f32.xlu0 %v2451_v24  ;;  %v2476_v61 = vcvt.s32.f32 %v2474_v6  ;;  %v2486_v62 = vshrl.u32 %v2392_v33, 16 }
 0x1f5   : > { %2467 = vadd.xlane.f32.xlu1 %v2464_v60  ;;  %v2473_v3 = vand.u32 65535, %v2391_v43  ;;  %vm2347_vm13 = vcmp.eq.f32.partialorder %v7391_v31, %v2310_v2  ;;  %5921 = vmatpush3.bf16.msra.mxu0 %v5920_v7  ;;  %v1040_v25 = vand.u32 4294901760, %v1039_v19  ;;  %v2393_v34 = vsel %vm7974_vm0, 1, %v9212_v27  ;;  %vm2378_vm9 = vmor %vm2330_vm6, %vm7983_vm15 }
 0x1f6   : > { %v5923_v30 = vpack.c.bf16 %v1026_v23, %v1019_v4  ;;  %6079 = vmatpush3.bf16.msra.mxu1 %v5920_v7  ;;  %v2463_v10 = vcvt.s32.f32 %v2461_v56  ;;  %5922 = vmatprep.subr.bf16.mxu0 %v9208_v28  ;;  %v1033_v36 = vand.u32 4294901760, %v1032_v14  ;;  %vm2331_vm7 = vcmp.gt.f32.partialorder %v7391_v31, %v2310_v2  ;;  %v2316_v23 = vpop.xlane.xlu1 %2315  ;;  %v2318_v44 = vpop.xlane.xlu0 %2317 }
 0x1f7   : > { %vm9250_vm10 = vcmp.lt.s32.totalorder %v7103_v16, %v7187_v37  ;;  %v2488_v43 = vcvt.s32.f32 %v2486_v62  ;;  %v2475_v8 = vcvt.s32.f32 %v2473_v3  ;;  %v2498_v49 = vshrl.u32 %v2393_v34, 16 }
 0x1f8   : > { %6081 = vmatprep.subr.bf16.mxu1 %v5923_v30  ;;  %vm2363_vm12 = vmand %vm2347_vm13, %vm9250_vm10  ;;  %2479 = vadd.xlane.f32.xlu0 %v2476_v61  ;;  %vm2348_vm0 = vcmp.eq.f32.partialorder %v7391_v31, %v2312_v58  ;;  %v5926_v48 = vpack.c.bf16 %v1040_v25, %v1033_v36  ;;  %v2394_v11 = vsel %vm2378_vm9, 1, %v9212_v27  ;;  %v2485_v29 = vand.u32 65535, %v2392_v33 }
 0x1f9   : > { %2465 = vadd.xlane.f32.xlu1 %v2463_v10  ;;  %5924 = vmatpush3.bf16.msra.mxu0 %v5923_v30  ;;  %vm2379_vm6 = vmor %vm2331_vm7, %vm2363_vm12  ;;  %vm2332_vm15 = vcmp.gt.f32.partialorder %v7391_v31, %v2312_v58  ;;  %vm9251_vm13 = vcmp.lt.s32.totalorder %v7103_v16, %v7190_v38  ;;  %v2500_v37 = vcvt.s32.f32 %v2498_v49  ;;  %v2510_v60 = vshrl.u32 %v2394_v11, 16  ;;  %v9258_v10 = vld [vmem:[#allocation15_spill] sm:$0xff] }
 0x1fa   : > { %6083 = vmatpush3.bf16.msra.mxu1 %v5923_v30  ;;  %5925 = vmatprep.subr.bf16.mxu0 %v9208_v28  ;;  %vm2364_vm10 = vmand %vm2348_vm0, %vm9251_vm13  ;;  %v2497_v24 = vand.u32 65535, %v2393_v34  ;;  %vm2349_vm9 = vcmp.eq.f32.partialorder %v7391_v31, %v2314_v20  ;;  %v5929_v6 = vpack.c.bf16 %v7480_v47, %v7473_v40  ;;  %v2395_v7 = vsel %vm2379_vm6, 1, %v9212_v27  ;;  %v2320_v61 = vpop.xlane.xlu1 %2319 }
 0x1fb   : > { %6085 = vmatprep.subr.bf16.mxu1 %v5926_v48  ;;  %v2487_v33 = vcvt.s32.f32 %v2485_v29  ;;  %vm2380_vm7 = vmor %vm2332_vm15, %vm2364_vm10  ;;  %vm2333_vm12 = vcmp.gt.f32.partialorder %v7391_v31, %v2314_v20  ;;  %vm9252_vm0 = vcmp.lt.s32.totalorder %v7103_v16, %v7205_v41  ;;  %v2512_v38 = vcvt.s32.f32 %v2510_v60  ;;  %v9260_v60 = vld [vmem:[#allocation25_spill] sm:$0xff] }
 0x1fc   : > { %2477 = vadd.xlane.f32.xlu0 %v2475_v8  ;;  %vm2365_vm13 = vmand %vm2349_vm9, %vm9252_vm0  ;;  %v2499_v40 = vcvt.s32.f32 %v2497_v24  ;;  %v2522_v47 = vshrl.u32 %v2395_v7, 16  ;;  %vm2350_vm6 = vcmp.eq.f32.partialorder %v7391_v31, %v2316_v23  ;;  %v5932_v19 = vpack.c.bf16 %v7514_v22, %v7505_v9  ;;  %v9263_v24 = vld [vmem:[#allocation29_spill] sm:$0xff] }
 0x1fd   : > { %2491 = vadd.xlane.f32.xlu1 %v2488_v43  ;;  %5927 = vmatpush3.bf16.msra.mxu0 %v5926_v48  ;;  %v2396_v2 = vsel %vm2380_vm7, 1, %v9212_v27  ;;  %vm2381_vm15 = vmor %vm2333_vm12, %vm2365_vm13  ;;  %v2509_v41 = vand.u32 65535, %v2394_v11  ;;  %vm2334_vm10 = vcmp.gt.f32.partialorder %v7391_v31, %v2316_v23  ;;  %vm9253_vm9 = vcmp.lt.s32.totalorder %v7103_v16, %v7208_v42 }
 0x1fe   : > { %6087 = vmatpush3.bf16.msra.mxu1 %v5926_v48  ;;  %5928 = vmatprep.subr.bf16.mxu0 %v9208_v28  ;;  %vm8034_vm0 = vmand %vm2350_vm6, %vm9253_vm9  ;;  %v2524_v9 = vcvt.s32.f32 %v2522_v47  ;;  %v2534_v22 = vshrl.u32 %v2396_v2, 16  ;;  %v2521_v4 = vand.u32 65535, %v2395_v7  ;;  %vm2351_vm7 = vcmp.eq.f32.partialorder %v7391_v31, %v2318_v44 }
 0x1ff   : > { %6089 = vmatprep.subr.bf16.mxu1 %v5929_v6  ;;  %v5935_v21 = vpack.c.bf16 %v7549_v0, %v7539_v53  ;;  %v2397_v14 = vsel %vm2381_vm15, 1, %v9212_v27  ;;  %v2511_v42 = vcvt.s32.f32 %v2509_v41  ;;  %vm2382_vm12 = vmor %vm2334_vm10, %vm8034_vm0  ;;  %vm2335_vm13 = vcmp.gt.f32.partialorder %v7391_v31, %v2318_v44  ;;  %v9275_v41 = vld [vmem:[#allocation19_spill] sm:$0xff] }
 0x200   : > { %2503 = vadd.xlane.f32.xlu0 %v2500_v37  ;;  %5072 = vmatmul.mubr.f32.vlgmr.msra.gmra.mrb[0].mxu0 %v7632_v15  ;;  %vm9256_vm6 = vcmp.lt.s32.totalorder %v7103_v16, %v7223_v45  ;;  %v2536_v53 = vcvt.s32.f32 %v2534_v22  ;;  %v2523_v0 = vcvt.s32.f32 %v2521_v4  ;;  %v2546_v62 = vshrl.u32 %v2397_v14, 16  ;;  %v9278_v22 = vld [vmem:[#allocation21_spill] sm:$0xff]  ;;  %v9279_v4 = vld [vmem:[#allocation23_spill] sm:$0xff] }
 0x201   : > { %2489 = vadd.xlane.f32.xlu1 %v2487_v33  ;;  %5285 = vmatmul.mubr.f32.vlgmr.msra.gmra.mrb[0].mxu1 %v7639_v12  ;;  %vm2367_vm15 = vmand %vm2351_vm7, %vm9256_vm6  ;;  %vm2352_vm9 = vcmp.eq.f32.partialorder %v7391_v31, %v2320_v61  ;;  %v5938_v3 = vpack.c.bf16 %v7586_v51, %v7575_v39  ;;  %v2398_v30 = vsel %vm2382_vm12, 1, %v9212_v27  ;;  %v2533_v25 = vand.u32 65535, %v2396_v2 }
 0x202   : > { %5930 = vmatpush3.bf16.msra.mxu0 %v5929_v6  ;;  %6091 = vmatpush3.bf16.msra.mxu1 %v5929_v6  ;;  %vm2383_vm10 = vmor %vm2335_vm13, %vm2367_vm15  ;;  %vm2336_vm0 = vcmp.gt.f32.partialorder %v7391_v31, %v2320_v61  ;;  %vm9257_vm7 = vcmp.lt.s32.totalorder %v7103_v16, %v7226_v46  ;;  %v2548_v45 = vcvt.s32.f32 %v2546_v62  ;;  %v2558_v39 = vshrl.u32 %v2398_v30, 16  ;;  %v9264_v6 = vld [vmem:[#allocation30_spill] sm:$0xff]  ;;  %v9282_v61 = vld [vmem:[#allocation33_spill] sm:$0xff] }
 0x203   : > { %6093 = vmatprep.subr.bf16.mxu1 %v5932_v19  ;;  %5931 = vmatprep.subr.bf16.mxu0 %v9208_v28  ;;  %vm2368_vm6 = vmand %vm2352_vm9, %vm9257_vm7  ;;  %v2545_v51 = vand.u32 65535, %v2397_v14  ;;  %v5941_v34 = vpack.c.bf16 %v7624_v5, %v7615_v57  ;;  %v2399_v58 = vsel %vm2383_vm10, 1, %v9212_v27  ;;  %v2535_v36 = vcvt.s32.f32 %v2533_v25  ;;  %v9281_v14 = vld [vmem:[#allocation31_spill] sm:$0xff] }
 0x204   : > { %2501 = vadd.xlane.f32.xlu0 %v2499_v40  ;;  %5287 = vmatprep.mubr.f32.mxu1 %v7655_v18  ;;  %vm2384_vm12 = vmor %vm2336_vm0, %vm2368_vm6  ;;  %v2560_v46 = vcvt.s32.f32 %v2558_v39  ;;  %v2570_v43 = vshrl.u32 %v2399_v58, 16  ;;  %v5944_v8 = vpack.c.bf16 %v7676_v35, %v7667_v1  ;;  %v2557_v5 = vand.u32 65535, %v2398_v30  ;;  %v6679_v30 = vld [vmem:[%s7075_s15] sm:$0xff] }
 0x205   : > { %2515 = vadd.xlane.f32.xlu1 %v2512_v38  ;;  %5106 = vmatprep.mubr.msk.f32.mxu0 %vm9232_vm1, %v9194_v32  ;;  %v2547_v31 = vcvt.s32.f32 %v2545_v51  ;;  %v2400_v57 = vsel %vm2384_vm12, 1, %v9212_v27  ;;  %v2569_v11 = vand.u32 65535, %v2399_v58  ;;  %v5947_v20 = vpack.c.bf16 %v7741_v59, %v7726_v26 }
 0x206   : > { %5933 = vmatpush3.bf16.msra.mxu0 %v5932_v19  ;;  %6095 = vmatpush3.bf16.msra.mxu1 %v5932_v19  ;;  %v2572_v49 = vcvt.s32.f32 %v2570_v43  ;;  %v2582_v48 = vshrl.u32 %v2400_v57, 16  ;;  %v2559_v29 = vcvt.s32.f32 %v2557_v5  ;;  %v5950_v35 = vpack.c.bf16 %v7819_v63, %v7828_v50  ;;  %v9261_v63 = vld [vmem:[#allocation26_spill] sm:$0xff]  ;;  %v9272_v19 = vld [vmem:[#allocation17_spill] sm:$0xff] }
 0x207   : > { %6097 = vmatprep.subr.bf16.mxu1 %v5935_v21  ;;  %5934 = vmatprep.subr.bf16.mxu0 %v9208_v28  ;;  %v2571_v1 = vcvt.s32.f32 %v2569_v11  ;;  %v2581_v37 = vand.u32 65535, %v2400_v57  ;;  %v9266_v23 = vand.u32 4294901760, %v9258_v10  ;;  %vm9271_vm13 = vnez %v9217_v13 }
 0x208   : > { %2527 = vadd.xlane.f32.xlu0 %v2524_v9  ;;  %5288 = vmatmul.mubr.f32.gmra.mrb[2].mxu1 %v7658_v55  ;;  %v2584_v27 = vcvt.s32.f32 %v2582_v48  ;;  %v9273_v2 = vand.u32 4294901760, %v9260_v60  ;;  %v9274_v44 = vand.u32 4294901760, %v9261_v63  ;;  %v9276_v56 = vand.u32 4294901760, %v9263_v24 }
 0x209   : > { %2513 = vadd.xlane.f32.xlu1 %v2511_v42  ;;  %5322 = vmatprep.mubr.f32.mxu1 %v9258_v10  ;;  %v2583_v26 = vcvt.s32.f32 %v2581_v37  ;;  %v9277_v9 = vand.u32 4294901760, %v9264_v6  ;;  %v8272_v25 = vand.u32 4294901760, %v6679_v30 }
 0x20a   : > { %5936 = vmatpush3.bf16.msra.mxu0 %v5935_v21  ;;  %6099 = vmatpush3.bf16.msra.mxu1 %v5935_v21  ;;  %v9280_v21 = vld [vmem:[#allocation27_spill] sm:$0xff] }
 0x20b   : > { %6101 = vmatprep.subr.bf16.mxu1 %v5938_v3  ;;  %5937 = vmatprep.subr.bf16.mxu0 %v9208_v28 }
 0x20c   : > { %2525 = vadd.xlane.f32.xlu0 %v2523_v0 }
 0x20d   : > { %2539 = vadd.xlane.f32.xlu1 %v2536_v53 }
 0x20e   : > { %5939 = vmatpush3.bf16.msra.mxu0 %v5938_v3  ;;  %6103 = vmatpush3.bf16.msra.mxu1 %v5938_v3 }
 0x20f   : > { %6105 = vmatprep.subr.bf16.mxu1 %v5941_v34  ;;  %5940 = vmatprep.subr.bf16.mxu0 %v9208_v28 }
 0x210   : > { %2551 = vadd.xlane.f32.xlu0 %v2548_v45 }
 0x211   : > { %2537 = vadd.xlane.f32.xlu1 %v2535_v36  ;;  %v8286_v36 = vsub.f32 %v6679_v30, %v8272_v25 }
 0x212   : > { %5942 = vmatpush3.bf16.msra.mxu0 %v5941_v34  ;;  %6107 = vmatpush3.bf16.msra.mxu1 %v5941_v34 }
 0x213   : > { %6109 = vmatprep.subr.bf16.mxu1 %v5944_v8  ;;  %5943 = vmatprep.subr.bf16.mxu0 %v9208_v28 }
 0x214   : > { %2549 = vadd.xlane.f32.xlu0 %v2547_v31 }
 0x215   : > { %2563 = vadd.xlane.f32.xlu1 %v2560_v46 }
 0x216   : > { %5945 = vmatpush3.bf16.msra.mxu0 %v5944_v8  ;;  %6111 = vmatpush3.bf16.msra.mxu1 %v5944_v8 }
 0x217   : > { %6113 = vmatprep.subr.bf16.mxu1 %v5947_v20  ;;  %5946 = vmatprep.subr.bf16.mxu0 %v9208_v28 }
 0x218   : > { %2575 = vadd.xlane.f32.xlu0 %v2572_v49 }
 0x219   : > { %2561 = vadd.xlane.f32.xlu1 %v2559_v29 }
 0x21a   : > { %5948 = vmatpush3.bf16.msra.mxu0 %v5947_v20  ;;  %6115 = vmatpush3.bf16.msra.mxu1 %v5947_v20  ;;  %v9128_v20 = vand.u32 4294901760, %v8286_v36 }
 0x21b   : > { %6117 = vmatprep.subr.bf16.mxu1 %v5950_v35  ;;  %5949 = vmatprep.subr.bf16.mxu0 %v9208_v28 }
 0x21c   : > { %2573 = vadd.xlane.f32.xlu0 %v2571_v1 }
 0x21d   : > { %2587 = vadd.xlane.f32.xlu1 %v2584_v27 }
 0x21e   : > { %5951 = vmatpush3.bf16.msra.mxu0 %v5950_v35  ;;  %6119 = vmatpush3.bf16.msra.mxu1 %v5950_v35 }
 0x21f   : > { %6121 = vmatprep.subr.msk.bf16.mxu1 %vm7476_vm3, %v9206_v54  ;;  %5952 = vmatprep.subr.bf16.mxu0 %v9208_v28 }
 0x221   : > { %2585 = vadd.xlane.f32.xlu1 %v2583_v26  ;;  %5107 = vmatmul.mubr.f32.vlgmr.msra.gmra.mrb[0].mxu0 %v9260_v60 }
 0x222   : > { %5323 = vmatmul.mubr.f32.vlgmr.msra.gmra.mrb[0].mxu1 %v9261_v63  ;;  %5954 = vmatpush3.bf16.msk.msra.mxu0 %vm7476_vm3, %v9206_v54 }
 0x223   : > { %6123 = vmatpush3.bf16.msk.msra.mxu1 %vm7476_vm3, %v9206_v54  ;;  %5955 = vmatprep.subr.bf16.mxu0 %v9208_v28 }
 0x224   : > { %6125 = vmatprep.subr.msk.bf16.mxu1 %vm7510_vm8, %v9206_v54  ;;  %5325 = vmatprep.mubr.f32.mxu1 %v9263_v24  ;;  %v3367_v24 = vsub.f32 %v8286_v36, %v9128_v20 }
 0x225   : > { %5141 = vmatprep.mubr.msk.f32.mxu0 %vm9232_vm1, %v9194_v32 }
 0x226   : > { %5326 = vmatmul.mubr.f32.gmra.mrb[2].mxu1 %v9264_v6  ;;  %5957 = vmatpush3.bf16.msk.msra.mxu0 %vm7510_vm8, %v9206_v54 }
 0x227   : > { %6127 = vmatpush3.bf16.msk.msra.mxu1 %vm7510_vm8, %v9206_v54  ;;  %5958 = vmatprep.subr.bf16.mxu0 %v9208_v28 }
 0x228   : > { %6129 = vmatprep.subr.msk.bf16.mxu1 %vm7544_vm5, %v9206_v54  ;;  %5360 = vmatprep.mubr.f32.mxu1 %v9266_v23 }
 0x22a   : > { %5960 = vmatpush3.bf16.msk.msra.mxu0 %vm7544_vm5, %v9206_v54 }
 0x22b   : > { %6131 = vmatpush3.bf16.msk.msra.mxu1 %vm7544_vm5, %v9206_v54  ;;  %5961 = vmatprep.subr.bf16.mxu0 %v9208_v28 }
 0x22c   : > { %6133 = vmatprep.subr.msk.bf16.mxu1 %vm7580_vm2, %v9206_v54 }
 0x22e   : > { %5963 = vmatpush3.bf16.msk.msra.mxu0 %vm7580_vm2, %v9206_v54 }
 0x22f   : > { %6135 = vmatpush3.bf16.msk.msra.mxu1 %vm7580_vm2, %v9206_v54  ;;  %5964 = vmatprep.subr.bf16.mxu0 %v9208_v28 }
 0x230   : > { %6137 = vmatprep.subr.msk.bf16.mxu1 %vm7620_vm4, %v9206_v54 }
 0x232   : > { %5966 = vmatpush3.bf16.msk.msra.mxu0 %vm7620_vm4, %v9206_v54 }
 0x233   : > { %6139 = vmatpush3.bf16.msk.msra.mxu1 %vm7620_vm4, %v9206_v54  ;;  %5967 = vmatprep.subr.bf16.mxu0 %v9208_v28 }
 0x234   : > { %6141 = vmatprep.subr.msk.bf16.mxu1 %vm7672_vm11, %v9206_v54 }
 0x236   : > { %5969 = vmatpush3.bf16.msk.msra.mxu0 %vm7672_vm11, %v9206_v54 }
 0x237   : > { %6143 = vmatpush3.bf16.msk.msra.mxu1 %vm7672_vm11, %v9206_v54  ;;  %5970 = vmatprep.subr.bf16.mxu0 %v9208_v28 }
 0x238   : > { %6145 = vmatprep.subr.msk.bf16.mxu1 %vm7731_vm14, %v9206_v54 }
 0x23a   : > { %5972 = vmatpush3.bf16.msk.msra.mxu0 %vm7731_vm14, %v9206_v54 }
 0x23b   : > { %6147 = vmatpush3.bf16.msk.msra.mxu1 %vm7731_vm14, %v9206_v54  ;;  %5973 = vmatprep.subr.bf16.mxu0 %v9208_v28 }
 0x23c   : > { %6149 = vmatprep.subr.msk.bf16.mxu1 %vm9271_vm13, %v9206_v54 }
 0x23e   : > { %5975 = vmatpush3.bf16.msk.msra.mxu0 %vm9271_vm13, %v9206_v54 }
 0x23f   : > { %6151 = vmatpush3.bf16.msk.msra.mxu1 %vm9271_vm13, %v9206_v54  ;;  %5976 = vmatprep.subr.bf16.mxu0 %v9208_v28 }
 0x240   : > { %6153 = vmatprep.subr.bf16.mxu1 %v9272_v19 }
 0x241   : > { %5142 = vmatmul.mubr.f32.vlgmr.msra.gmra.mrb[0].mxu0 %v9273_v2  ;;  %v3368_v2 = vand.u32 4294901760, %v3367_v24 }
 0x242   : > { %5361 = vmatmul.mubr.f32.vlgmr.msra.gmra.mrb[0].mxu1 %v9274_v44  ;;  %5978 = vmatpush3.bf16.msra.mxu0 %v9272_v19 }
 0x243   : > { %6155 = vmatpush3.bf16.msra.mxu1 %v9272_v19  ;;  %5979 = vmatprep.subr.bf16.mxu0 %v9208_v28 }
 0x244   : > { %6157 = vmatprep.subr.bf16.mxu1 %v9275_v41  ;;  %5363 = vmatprep.mubr.f32.mxu1 %v9276_v56 }
 0x245   : > { %5176 = vmatprep.mubr.msk.f32.mxu0 %vm9232_vm1, %v9194_v32 }
 0x246   : > { %5364 = vmatmul.mubr.f32.gmra.mrb[2].mxu1 %v9277_v9  ;;  %5981 = vmatpush3.bf16.msra.mxu0 %v9275_v41 }
 0x247   : > { %6159 = vmatpush3.bf16.msra.mxu1 %v9275_v41  ;;  %5982 = vmatprep.subr.bf16.mxu0 %v9208_v28 }
 0x248   : > { %6161 = vmatprep.subr.bf16.mxu1 %v9278_v22  ;;  %5398 = vmatprep.mubr.f32.mxu1 %v7430_v52 }
 0x24a   : > { %5984 = vmatpush3.bf16.msra.mxu0 %v9278_v22 }
 0x24b   : > { %6163 = vmatpush3.bf16.msra.mxu1 %v9278_v22  ;;  %5985 = vmatprep.subr.bf16.mxu0 %v9208_v28 }
 0x24c   : > { %6165 = vmatprep.subr.bf16.mxu1 %v9279_v4 }
 0x24e   : > { %5987 = vmatpush3.bf16.msra.mxu0 %v9279_v4 }
 0x24f   : > { %6167 = vmatpush3.bf16.msra.mxu1 %v9279_v4  ;;  %5988 = vmatprep.subr.bf16.mxu0 %v9208_v28 }
 0x250   : > { %6169 = vmatprep.subr.bf16.mxu1 %v9280_v21 }
 0x252   : > { %5990 = vmatpush3.bf16.msra.mxu0 %v9280_v21 }
 0x253   : > { %6171 = vmatpush3.bf16.msra.mxu1 %v9280_v21  ;;  %5991 = vmatprep.subr.bf16.mxu0 %v9208_v28 }
 0x254   : > { %6173 = vmatprep.subr.bf16.mxu1 %v9281_v14 }
 0x256   : > { %5993 = vmatpush3.bf16.msra.mxu0 %v9281_v14 }
 0x257   : > { %6175 = vmatpush3.bf16.msra.mxu1 %v9281_v14  ;;  %5994 = vmatprep.subr.bf16.mxu0 %v9208_v28 }
 0x258   : > { %6177 = vmatprep.subr.bf16.mxu1 %v9282_v61 }
 0x25a   : > { %5996 = vmatpush3.bf16.msra.mxu0 %v9282_v61 }
 0x25b   : > { %6179 = vmatpush3.bf16.msra.mxu1 %v9282_v61  ;;  %5997 = vmatprep.subr.bf16.mxu0 %v9208_v28 }
 0x25c   : > { %6181 = vmatprep.subr.bf16.mxu1 %v7890_v17 }
 0x25e   : > { %5999 = vmatpush3.bf16.msra.mxu0 %v7890_v17 }
 0x25f   : > { %6183 = vmatpush3.bf16.msra.mxu1 %v7890_v17  ;;  %6000 = vmatprep.subr.bf16.mxu0 %v9208_v28 }
 0x260   : > { %6185 = vmatprep.subr.msk.bf16.mxu1 %vm7476_vm3, %v9206_v54 }
 0x261   : > { %5177 = vmatmul.mubr.f32.vlgmr.msra.gmra.mrb[0].mxu0 %v7632_v15 }
 0x262   : > { %5399 = vmatmul.mubr.f32.vlgmr.msra.gmra.mrb[0].mxu1 %v7639_v12  ;;  %6002 = vmatpush3.bf16.msk.msra.mxu0 %vm7476_vm3, %v9206_v54 }
 0x263   : > { %6187 = vmatpush3.bf16.msk.msra.mxu1 %vm7476_vm3, %v9206_v54  ;;  %6003 = vmatprep.subr.bf16.mxu0 %v9208_v28 }
 0x264   : > { %6189 = vmatprep.subr.msk.bf16.mxu1 %vm7510_vm8, %v9206_v54  ;;  %5401 = vmatprep.mubr.f32.mxu1 %v7655_v18 }
 0x265   : > { %5211 = vmatprep.mubr.msk.f32.mxu0 %vm9232_vm1, %v9194_v32 }
 0x266   : > { %5402 = vmatmul.mubr.f32.gmra.mrb[2].mxu1 %v7658_v55  ;;  %6005 = vmatpush3.bf16.msk.msra.mxu0 %vm7510_vm8, %v9206_v54 }
 0x267   : > { %6191 = vmatpush3.bf16.msk.msra.mxu1 %vm7510_vm8, %v9206_v54  ;;  %6006 = vmatprep.subr.bf16.mxu0 %v9208_v28 }
 0x268   : > { %6193 = vmatprep.subr.msk.bf16.mxu1 %vm7544_vm5, %v9206_v54  ;;  %5436 = vmatprep.mubr.f32.mxu1 %v7430_v52 }
 0x26a   : > { %6008 = vmatpush3.bf16.msk.msra.mxu0 %vm7544_vm5, %v9206_v54 }
 0x26b   : > { %6195 = vmatpush3.bf16.msk.msra.mxu1 %vm7544_vm5, %v9206_v54  ;;  %6009 = vmatprep.subr.bf16.mxu0 %v9208_v28 }
 0x26c   : > { %6197 = vmatprep.subr.msk.bf16.mxu1 %vm7580_vm2, %v9206_v54 }
 0x26d   : > { %v2408_v17 = vpop.xlane.xlu0 %2407 }
 0x26e   : > { %v2410_v42 = vcvt.f32.s32 %v2408_v17  ;;  %6011 = vmatpush3.bf16.msk.msra.mxu0 %vm7580_vm2, %v9206_v54 }
 0x26f   : > { %6199 = vmatpush3.bf16.msk.msra.mxu1 %vm7580_vm2, %v9206_v54  ;;  %6012 = vmatprep.subr.bf16.mxu0 %v9208_v28 }
 0x270   : > { %6201 = vmatprep.subr.msk.bf16.mxu1 %vm7620_vm4, %v9206_v54  ;;  %v2411_v52 = vshll.u32 %v2410_v42, 16 }
 0x271   : > { %v2420_v53 = vpop.xlane.xlu1 %2419  ;;  %v2406_v0 = vpop.xlane.xlu0 %2405 }
 0x272   : > { %v2422_v62 = vcvt.f32.s32 %v2420_v53  ;;  %v2409_v3 = vcvt.f32.s32 %v2406_v0  ;;  %6014 = vmatpush3.bf16.msk.msra.mxu0 %vm7620_vm4, %v9206_v54 }
 0x273   : > { %6203 = vmatpush3.bf16.msk.msra.mxu1 %vm7620_vm4, %v9206_v54  ;;  %6015 = vmatprep.subr.bf16.mxu0 %v9208_v28 }
 0x274   : > { %6205 = vmatprep.subr.msk.bf16.mxu1 %vm7672_vm11, %v9206_v54  ;;  %v2412_v45 = vadd.s32 %v2411_v52, %v2409_v3  ;;  %v2423_v34 = vshll.u32 %v2422_v62, 16 }
 0x275   : > { %v2432_v51 = vpop.xlane.xlu0 %2431 }
 0x276   : > { %v2418_v39 = vpop.xlane.xlu1 %2417  ;;  %vm2593_vm3 = vcmp.eq.s32.totalorder %v2412_v45, %v7103_v16  ;;  %v2434_v10 = vcvt.f32.s32 %v2432_v51  ;;  %6017 = vmatpush3.bf16.msk.msra.mxu0 %vm7672_vm11, %v9206_v54 }
 0x277   : > { %v2421_v58 = vcvt.f32.s32 %v2418_v39  ;;  %6207 = vmatpush3.bf16.msk.msra.mxu1 %vm7672_vm11, %v9206_v54  ;;  %6018 = vmatprep.subr.bf16.mxu0 %v9208_v28  ;;  %v4436_v46 = vsel %vm2593_vm3, 1.0, %v9194_v32 }
 0x278   : > { %6209 = vmatprep.subr.msk.bf16.mxu1 %vm7731_vm14, %v9206_v54  ;;  %v2435_v43 = vshll.u32 %v2434_v10, 16  ;;  %v8298_v48 = vsub.f32 %v4436_v46, %v4436_v46 }
 0x279   : > { %v2424_v31 = vadd.s32 %v2423_v34, %v2421_v58  ;;  %v2430_v57 = vpop.xlane.xlu0 %2429 }
 0x27a   : > { %v2444_v8 = vpop.xlane.xlu1 %2443  ;;  %v2433_v49 = vcvt.f32.s32 %v2430_v57  ;;  %6020 = vmatpush3.bf16.msk.msra.mxu0 %vm7731_vm14, %v9206_v54  ;;  %v2735_v63 = vand.u32 4294901760, %v8298_v48 }
 0x27b   : > { %vm2594_vm8 = vcmp.eq.s32.totalorder %v2424_v31, %v7103_v16  ;;  %v2446_v5 = vcvt.f32.s32 %v2444_v8  ;;  %6211 = vmatpush3.bf16.msk.msra.mxu1 %vm7731_vm14, %v9206_v54  ;;  %6021 = vmatprep.subr.bf16.mxu0 %v9208_v28 }
 0x27c   : > { %v4437_v11 = vsel %vm2594_vm8, 1.0, %v9194_v32  ;;  %6213 = vmatprep.subr.msk.bf16.mxu1 %vm9271_vm13, %v9206_v54  ;;  %v2436_v27 = vadd.s32 %v2435_v43, %v2433_v49  ;;  %vm8310_vm5 = vmpackc.low %vm2594_vm8, %vm2593_vm3 }
 0x27d   : > { %v8306_v29 = vsub.f32 %v4437_v11, %v4437_v11  ;;  %v2456_v35 = vpop.xlane.xlu0 %2455  ;;  %v2447_v26 = vshll.u32 %v2446_v5, 16 }
 0x27e   : > { %v2442_v1 = vpop.xlane.xlu1 %2441  ;;  %vm2595_vm2 = vcmp.eq.s32.totalorder %v2436_v27, %v7103_v16  ;;  %v2458_v60 = vcvt.f32.s32 %v2456_v35  ;;  %6023 = vmatpush3.bf16.msk.msra.mxu0 %vm9271_vm13, %v9206_v54 }
 0x27f   : > { %v2445_v59 = vcvt.f32.s32 %v2442_v1  ;;  %6215 = vmatpush3.bf16.msk.msra.mxu1 %vm9271_vm13, %v9206_v54  ;;  %6216 = vmatprep.subr.bf16.mxu0 %v9208_v28  ;;  %v2742_v50 = vand.u32 4294901760, %v8306_v29  ;;  %v4438_v6 = vsel %vm2595_vm2, 1.0, %v9194_v32 }
 0x280   : > { %6361 = vmatprep.subr.msk.bf16.mxu1 %vm8310_vm5, %v9206_v54  ;;  %v2459_v7 = vshll.u32 %v2458_v60, 16 }
 0x281   : > { %v2448_v13 = vadd.s32 %v2447_v26, %v2445_v59  ;;  %v2454_v33 = vpop.xlane.xlu0 %2453  ;;  %5212 = vmatmul.mubr.f32.vlgmr.msra.gmra.mrb[0].mxu0 %v7632_v15  ;;  %v8339_v38 = vpack.c.bf16 %v2742_v50, %v2735_v63  ;;  %v8348_v15 = vsub.f32 %v4438_v6, %v4438_v6 }
 0x282   : > { %v2468_v23 = vpop.xlane.xlu1 %2467  ;;  %5437 = vmatmul.mubr.f32.vlgmr.msra.gmra.mrb[0].mxu1 %v7639_v12  ;;  %v2457_v47 = vcvt.f32.s32 %v2454_v33  ;;  %6218 = vmatpush3.bf16.msk.msra.mxu0 %vm8310_vm5, %v9206_v54 }
 0x283   : > { %vm2596_vm4 = vcmp.eq.s32.totalorder %v2448_v13, %v7103_v16  ;;  %v2470_v40 = vcvt.f32.s32 %v2468_v23  ;;  %6363 = vmatpush3.bf16.msk.msra.mxu1 %vm8310_vm5, %v9206_v54  ;;  %5439 = vmatprep.mubr.f32.mxu1 %v7655_v18  ;;  %v2749_v21 = vand.u32 4294901760, %v8348_v15 }
 0x284   : > { %v4439_v12 = vsel %vm2596_vm4, 1.0, %v9194_v32  ;;  %vm8353_vm11 = vmpackc.low %vm2596_vm4, %vm2595_vm2  ;;  %6219 = vmatprep.subr.bf16.mxu0 %v9208_v28  ;;  %v2460_v41 = vadd.s32 %v2459_v7, %v2457_v47  ;;  %5474 = vmatprep.mubr.msk.f32.mxu0 %vm9232_vm1, %v9194_v32 }
 0x285   : > { %v8359_v44 = vsub.f32 %v4439_v12, %v4439_v12  ;;  %6365 = vmatprep.subr.msk.bf16.mxu1 %vm8353_vm11, %v9206_v54  ;;  %v2480_v9 = vpop.xlane.xlu0 %2479  ;;  %v2471_v22 = vshll.u32 %v2470_v40, 16 }
 0x286   : > { %v2466_v56 = vpop.xlane.xlu1 %2465  ;;  %5440 = vmatmul.mubr.f32.gmra.mrb[2].mxu1 %v7658_v55  ;;  %vm2597_vm14 = vcmp.eq.s32.totalorder %v2460_v41, %v7103_v16  ;;  %v2482_v4 = vcvt.f32.s32 %v2480_v9  ;;  %6221 = vmatpush3.bf16.msk.msra.mxu0 %vm8353_vm11, %v9206_v54 }
 0x287   : > { %v2469_v18 = vcvt.f32.s32 %v2466_v56  ;;  %6367 = vmatpush3.bf16.msk.msra.mxu1 %vm8353_vm11, %v9206_v54  ;;  %6222 = vmatprep.subr.bf16.mxu0 %v9208_v28  ;;  %v2756_v55 = vand.u32 4294901760, %v8359_v44  ;;  %v4440_v14 = vsel %vm2597_vm14, 1.0, %v9194_v32 }
 0x288   : > { %5684 = vmatprep.mubr.f32.mxu1 %v3368_v2  ;;  %v2483_v17 = vshll.u32 %v2482_v4, 16  ;;  %v8387_v3 = vsub.f32 %v4440_v14, %v4440_v14 }
 0x289   : > { %v2472_v61 = vadd.s32 %v2471_v22, %v2469_v18  ;;  %v2478_v52 = vpop.xlane.xlu0 %2477  ;;  %v8384_v53 = vpack.c.bf16 %v2756_v55, %v2749_v21 }
 0x28a   : > { %v2492_v42 = vpop.xlane.xlu1 %2491  ;;  %v2481_v62 = vcvt.f32.s32 %v2478_v52  ;;  %v2763_v43 = vand.u32 4294901760, %v8387_v3 }
 0x28b   : > { %vm2598_vm15 = vcmp.eq.s32.totalorder %v2472_v61, %v7103_v16  ;;  %v2494_v0 = vcvt.f32.s32 %v2492_v42 }
 0x28c   : > { %v4441_v30 = vsel %vm2598_vm15, 1.0, %v9194_v32  ;;  %vm8392_vm9 = vmpackc.low %vm2598_vm15, %vm2597_vm14  ;;  %v2484_v51 = vadd.s32 %v2483_v17, %v2481_v62 }
 0x28d   : > { %v8396_v39 = vsub.f32 %v4441_v30, %v4441_v30  ;;  %6224 = vmatpush3.bf16.msk.msra.mxu0 %vm8392_vm9, %v9206_v54  ;;  %6369 = vmatprep.subr.msk.bf16.mxu1 %vm8392_vm9, %v9206_v54  ;;  %v2504_v58 = vpop.xlane.xlu0 %2503  ;;  %v2495_v10 = vshll.u32 %v2494_v0, 16 }
 0x28e   : > { %v2490_v34 = vpop.xlane.xlu1 %2489  ;;  %6371 = vmatpush3.bf16.msk.msra.mxu1 %vm8392_vm9, %v9206_v54  ;;  %6225 = vmatprep.subr.bf16.mxu0 %v9208_v28  ;;  %vm2599_vm10 = vcmp.eq.s32.totalorder %v2484_v51, %v7103_v16  ;;  %v2506_v31 = vcvt.f32.s32 %v2504_v58 }
 0x28f   : > { %v2493_v46 = vcvt.f32.s32 %v2490_v34  ;;  %v2770_v8 = vand.u32 4294901760, %v8396_v39  ;;  %v4442_v57 = vsel %vm2599_vm10, 1.0, %v9194_v32 }
 0x290   : > { %v2507_v49 = vshll.u32 %v2506_v31, 16  ;;  %v8421_v59 = vsub.f32 %v4442_v57, %v4442_v57 }
 0x291   : > { %v2496_v5 = vadd.s32 %v2495_v10, %v2493_v46  ;;  %v2502_v27 = vpop.xlane.xlu0 %2501  ;;  %v8418_v1 = vpack.c.bf16 %v2770_v8, %v2763_v43  ;;  %v2255_v46 = vld [vmem:[%s393_s29] sm:$0x7]  ;;  %s6747_s29 = sshll.u32 %s6856_s19, 4  ;;  %s6748_s29 = int_to_ptr.vmem [resolvable:$false] %s6747_s29 }
 0x292   : > { %v2516_v11 = vpop.xlane.xlu1 %2515  ;;  %v2505_v26 = vcvt.f32.s32 %v2502_v27  ;;  %v9133_v12 = vand.u32 4294901760, %v8421_v59  ;;  %s6749_s8 = scalar_lea.vmem %s6748_s29, 1024  ;;  %p6750_p7 = scmp.lt.s32.totalorder %s8937_s10, %s6748_s29 }
 0x293   : > { %vm2600_vm0 = vcmp.eq.s32.totalorder %v2496_v5, %v7103_v16  ;;  %v2518_v35 = vcvt.f32.s32 %v2516_v11  ;;  %p6751_p9 = scmp.lt.s32.totalorder %s6749_s8, %s6743_s2 }
 0x294   : > { %v4443_v60 = vsel %vm2600_vm0, 1.0, %v9194_v32  ;;  %vm8426_vm7 = vmpackc.low %vm2600_vm0, %vm2599_vm10  ;;  %v2508_v13 = vadd.s32 %v2507_v49, %v2505_v26  ;;  %v8486_v26 = vand.u32 4294901760, %v2255_v46 }
 0x295   : > { %v8430_v6 = vsub.f32 %v4443_v60, %v4443_v60  ;;  %6227 = vmatpush3.bf16.msk.msra.mxu0 %vm8426_vm7, %v9206_v54  ;;  %6373 = vmatprep.subr.msk.bf16.mxu1 %vm8426_vm7, %v9206_v54  ;;  %v2528_v23 = vpop.xlane.xlu0 %2527  ;;  %v2519_v33 = vshll.u32 %v2518_v35, 16  ;;  %v6680_v60 = vld [vmem:[%s7075_s15 + $0x8] sm:$0xff]  ;;  %p6752_p11 = por %p6751_p9, %p6750_p7 }
 0x296   : > { %v2514_v7 = vpop.xlane.xlu1 %2513  ;;  %6375 = vmatpush3.bf16.msk.msra.mxu1 %vm8426_vm7, %v9206_v54  ;;  %6228 = vmatprep.subr.bf16.mxu0 %v9208_v28  ;;  %vm2601_vm6 = vcmp.eq.s32.totalorder %v2508_v13, %v7103_v16  ;;  %v2530_v47 = vcvt.f32.s32 %v2528_v23  ;;  %v8489_v13 = vand.u32 4294901760, %v6680_v60 }
 0x297   : > { %v2517_v40 = vcvt.f32.s32 %v2514_v7  ;;  %v9135_v2 = vand.u32 4294901760, %v8430_v6  ;;  %v4444_v41 = vsel %vm2601_vm6, 1.0, %v9194_v32  ;;  %p6753_p3 = pnand %p6752_p11, %p6746_p5 }
 0x298   : > { %v2531_v9 = vshll.u32 %v2530_v47, 16  ;;  %v8455_v17 = vsub.f32 %v4444_v41, %v4444_v41 }
 0x299   : > { %v2520_v56 = vadd.s32 %v2519_v33, %v2517_v40  ;;  %v2526_v18 = vpop.xlane.xlu0 %2525  ;;  %v8452_v4 = vpack.c.bf16 %v9135_v2, %v9133_v12 }
 0x29a   : > { %v2540_v22 = vpop.xlane.xlu1 %2539  ;;  %v2529_v61 = vcvt.f32.s32 %v2526_v18  ;;  %v9131_v31 = vand.u32 4294901760, %v8455_v17 }
 0x29b   : > { %vm2602_vm12 = vcmp.eq.s32.totalorder %v2520_v56, %v7103_v16  ;;  %v2542_v14 = vcvt.f32.s32 %v2540_v22 }
 0x29c   : > { %v4445_v42 = vsel %vm2602_vm12, 1.0, %v9194_v32  ;;  %vm8460_vm13 = vmpackc.low %vm2602_vm12, %vm2601_vm6  ;;  %v2532_v62 = vadd.s32 %v2531_v9, %v2529_v61  ;;  %v8523_v61 = vsub.f32 %v6680_v60, %v8489_v13 }
 0x29d   : > { %v8468_v0 = vsub.f32 %v4445_v42, %v4445_v42  ;;  %6230 = vmatpush3.bf16.msk.msra.mxu0 %vm8460_vm13, %v9206_v54  ;;  %6377 = vmatprep.subr.msk.bf16.mxu1 %vm8460_vm13, %v9206_v54  ;;  %v2552_v51 = vpop.xlane.xlu0 %2551  ;;  %v2543_v34 = vshll.u32 %v2542_v14, 16  ;;  %v8520_v14 = vsub.f32 %v2255_v46, %v8486_v26  ;;  %v6681_v42 = vld [vmem:[%s7075_s15 + $0x10] sm:$0xff] }
 0x29e   : > { %v2538_v30 = vpop.xlane.xlu1 %2537  ;;  %6379 = vmatpush3.bf16.msk.msra.mxu1 %vm8460_vm13, %v9206_v54  ;;  %6231 = vmatprep.subr.bf16.mxu0 %v9208_v28  ;;  %vm2603_vm3 = vcmp.eq.s32.totalorder %v2532_v62, %v7103_v16  ;;  %v2554_v10 = vcvt.f32.s32 %v2552_v51  ;;  %v8526_v62 = vand.u32 4294901760, %v6681_v42 }
 0x29f   : > { %v2541_v58 = vcvt.f32.s32 %v2538_v30  ;;  %v9132_v57 = vand.u32 4294901760, %v8468_v0  ;;  %v4446_v5 = vsel %vm2603_vm3, 1.0, %v9194_v32 }
 0x2a0   : > { %v2555_v11 = vshll.u32 %v2554_v10, 16  ;;  %v8498_v40 = vsub.f32 %v4446_v5, %v4446_v5  ;;  %v6682_v5 = vld [vmem:[%s7075_s15 + $0x18] sm:$0xff]  ;;  %s4558_s15 = sshll.u32 %s6921_s28, 9 }
 0x2a1   : > { %v2544_v49 = vadd.s32 %v2543_v34, %v2541_v58  ;;  %v2550_v35 = vpop.xlane.xlu0 %2549  ;;  %v8495_v7 = vpack.c.bf16 %v9132_v57, %v9131_v31  ;;  %s8945_s18 = scalar_lea.hbm %s9039_s6, %s4558_s15 }
 0x2a2   : > { %v2564_v27 = vpop.xlane.xlu1 %2563  ;;  %v2553_v33 = vcvt.f32.s32 %v2550_v35  ;;  %v9129_v10 = vand.u32 4294901760, %v8498_v40 }
 0x2a3   : > { %vm2604_vm8 = vcmp.eq.s32.totalorder %v2544_v49, %v7103_v16  ;;  %v2566_v23 = vcvt.f32.s32 %v2564_v27  ;;  %v8535_v49 = vand.u32 4294901760, %v6682_v5 }
 0x2a4   : > { %v4447_v47 = vsel %vm2604_vm8, 1.0, %v9194_v32  ;;  %vm8503_vm2 = vmpackc.low %vm2604_vm8, %vm2603_vm3  ;;  %v2556_v9 = vadd.s32 %v2555_v11, %v2553_v33  ;;  %v8540_v33 = vsub.f32 %v6681_v42, %v8526_v62  ;;  %v9134_v42 = vand.u32 4294901760, %v8520_v14 }
 0x2a5   : > { %v8507_v56 = vsub.f32 %v4447_v47, %v4447_v47  ;;  %6233 = vmatpush3.bf16.msk.msra.mxu0 %vm8503_vm2, %v9206_v54  ;;  %6381 = vmatprep.subr.msk.bf16.mxu1 %vm8503_vm2, %v9206_v54  ;;  %v2576_v18 = vpop.xlane.xlu0 %2575  ;;  %v2567_v30 = vshll.u32 %v2566_v23, 16 }
 0x2a6   : > { %v2562_v22 = vpop.xlane.xlu1 %2561  ;;  %6383 = vmatpush3.bf16.msk.msra.mxu1 %vm8503_vm2, %v9206_v54  ;;  %6234 = vmatprep.subr.bf16.mxu0 %v9208_v28  ;;  %vm2605_vm4 = vcmp.eq.s32.totalorder %v2556_v9, %v7103_v16  ;;  %v2578_v34 = vcvt.f32.s32 %v2576_v18  ;;  %v2743_v9 = vsub.f32 %v8306_v29, %v2742_v50 }
 0x2a7   : > { %v2565_v51 = vcvt.f32.s32 %v2562_v22  ;;  %v4448_v58 = vsel %vm2605_vm4, 1.0, %v9194_v32  ;;  %v9130_v46 = vand.u32 4294901760, %v8507_v56 }
 0x2a8   : > { %v2579_v27 = vshll.u32 %v2578_v34, 16  ;;  %v8537_v35 = vsub.f32 %v4448_v58, %v4448_v58  ;;  %v9136_v34 = vand.u32 4294901760, %v8523_v61  ;;  %v8559_v58 = vsub.f32 %v6682_v5, %v8535_v49 }
 0x2a9   : > { %v2568_v11 = vadd.s32 %v2567_v30, %v2565_v51  ;;  %v2574_v23 = vpop.xlane.xlu0 %2573  ;;  %v8546_v47 = vpack.c.bf16 %v9130_v46, %v9129_v10  ;;  %v2736_v5 = vsub.f32 %v8298_v48, %v2735_v63  ;;  %v2725_v46 = vsub.f32 %v8520_v14, %v9134_v42 }
 0x2aa   : > { %v2588_v60 = vpop.xlane.xlu1 %2587  ;;  %v2577_v18 = vcvt.f32.s32 %v2574_v23  ;;  %v9139_v23 = vand.u32 4294901760, %v8540_v33  ;;  %v3377_v63 = vsub.f32 %v8523_v61, %v9136_v34  ;;  %v9138_v31 = vand.u32 4294901760, %v8559_v58 }
 0x2ab   : > { %vm2606_vm14 = vcmp.eq.s32.totalorder %v2568_v11, %v7103_v16  ;;  %v2590_v22 = vcvt.f32.s32 %v2588_v60  ;;  %v2744_v57 = vand.u32 4294901760, %v2743_v9  ;;  %v2750_v9 = vsub.f32 %v8348_v15, %v2749_v21 }
 0x2ac   : > { %v4449_v30 = vsel %vm2606_vm14, 1.0, %v9194_v32  ;;  %vm8552_vm15 = vmpackc.low %vm2606_vm14, %vm2605_vm4  ;;  %v2580_v11 = vadd.s32 %v2579_v27, %v2577_v18  ;;  %v9137_v27 = vand.u32 4294901760, %v8537_v35  ;;  %v3387_v42 = vsub.f32 %v8540_v33, %v9139_v23 }
 0x2ad   : > { %v8561_v20 = vsub.f32 %v4449_v30, %v4449_v30  ;;  %6236 = vmatpush3.bf16.msk.msra.mxu0 %vm8552_vm15, %v9206_v54  ;;  %6385 = vmatprep.subr.msk.bf16.mxu1 %vm8552_vm15, %v9206_v54  ;;  %v2591_v18 = vshll.u32 %v2590_v22, 16  ;;  %v2726_v34 = vand.u32 4294901760, %v2725_v46  ;;  %v2771_v46 = vsub.f32 %v8396_v39, %v2770_v8 }
 0x2ae   : > { %v2586_v60 = vpop.xlane.xlu1 %2585  ;;  %6387 = vmatpush3.bf16.msk.msra.mxu1 %vm8552_vm15, %v9206_v54  ;;  %6237 = vmatprep.subr.bf16.mxu0 %v9208_v28  ;;  %vm2607_vm10 = vcmp.eq.s32.totalorder %v2580_v11, %v7103_v16  ;;  %v3388_v11 = vand.u32 4294901760, %v3387_v42 }
 0x2af   : > { %v2589_v30 = vcvt.f32.s32 %v2586_v60  ;;  %v2826_v50 = vand.u32 4294901760, %v8561_v20  ;;  %v4450_v10 = vsel %vm2607_vm10, 1.0, %v9194_v32  ;;  %v2757_v60 = vsub.f32 %v8359_v44, %v2756_v55 }
 0x2b0   : > { %v8605_v2 = vsub.f32 %v4450_v10, %v4450_v10  ;;  %v3397_v10 = vsub.f32 %v8559_v58, %v9138_v31  ;;  %v9299_v31 = vand.u32 4294901760, %v8430_v6 }
 0x2b1   : > { %v2592_v22 = vadd.s32 %v2591_v18, %v2589_v30  ;;  %v8600_v12 = vpack.c.bf16 %v2826_v50, %v9137_v27  ;;  %v2737_v18 = vand.u32 4294901760, %v2736_v5  ;;  %v3378_v27 = vand.u32 4294901760, %v3377_v63 }
 0x2b2   : > { %v2758_v21 = vand.u32 4294901760, %v2757_v60  ;;  %v2751_v5 = vand.u32 4294901760, %v2750_v9  ;;  %v2764_v63 = vsub.f32 %v8387_v3, %v2763_v43  ;;  %v2785_v42 = vsub.f32 %v8430_v6, %v9299_v31 }
 0x2b3   : > { %vm2608_vm0 = vcmp.eq.s32.totalorder %v2592_v22, %v7103_v16  ;;  %v6241_v16 = vpack.c.bf16 %v2744_v57, %v2737_v18  ;;  %v2833_v57 = vand.u32 4294901760, %v8605_v2  ;;  %v3398_v18 = vand.u32 4294901760, %v3397_v10 }
 0x2b4   : > { %v4451_v55 = vsel %vm2608_vm0, 1.0, %v9194_v32  ;;  %vm8614_vm6 = vmpackc.low %vm2608_vm0, %vm2607_vm10  ;;  %v6244_v8 = vpack.c.bf16 %v2758_v21, %v2751_v5  ;;  %v2765_v43 = vand.u32 4294901760, %v2764_v63  ;;  %v9300_v9 = vand.u32 4294901760, %v8421_v59 }
 0x2b5   : > { %v8621_v22 = vsub.f32 %v4451_v55, %v4451_v55  ;;  %6239 = vmatpush3.bf16.msk.msra.mxu0 %vm8614_vm6, %v9206_v54  ;;  %6389 = vmatprep.subr.msk.bf16.mxu1 %vm8614_vm6, %v9206_v54  ;;  %v2772_v55 = vand.u32 4294901760, %v2771_v46  ;;  %v2786_v10 = vand.u32 4294901760, %v2785_v42  ;;  %v9301_v31 = vand.u32 4294901760, %v8468_v0 }
 0x2b6   : > { %6391 = vmatpush3.bf16.msk.msra.mxu1 %vm8614_vm6, %v9206_v54  ;;  %6240 = vmatprep.subr.bf16.mxu0 %v9208_v28  ;;  %v9302_v46 = vand.u32 4294901760, %v8455_v17 }
 0x2b7   : > { %6393 = vmatprep.subr.bf16.mxu1 %v6241_v16  ;;  %v2840_v60 = vand.u32 4294901760, %v8621_v22  ;;  %v2799_v21 = vsub.f32 %v8468_v0, %v9301_v31  ;;  %v9305_v31 = vand.u32 4294901760, %v8537_v35 }
 0x2b8   : > { %5475 = vmatmul.mubr.f32.vlgmr.msra.gmra.mrb[2].mxu0 %v2726_v34  ;;  %v2778_v34 = vsub.f32 %v8421_v59, %v9300_v9 }
 0x2b9   : > { %6242 = vmatpush3.bf16.msra.mxu0 %v6241_v16  ;;  %5685 = vmatmul.mubr.f32.vlgmr.msra.gmra.mrb[4].mxu1 %v3378_v27  ;;  %v8644_v23 = vpack.c.bf16 %v2840_v60, %v2833_v57  ;;  %v6247_v27 = vpack.c.bf16 %v2772_v55, %v2765_v43  ;;  %v2800_v63 = vand.u32 4294901760, %v2799_v21  ;;  %v9303_v55 = vand.u32 4294901760, %v8507_v56 }
 0x2ba   : > { %6395 = vmatpush3.bf16.msra.mxu1 %v6241_v16  ;;  %6243 = vmatprep.subr.bf16.mxu0 %v9208_v28  ;;  %v2779_v16 = vand.u32 4294901760, %v2778_v34  ;;  %v2820_v21 = vsub.f32 %v8537_v35, %v9305_v31 }
 0x2bb   : > { %6397 = vmatprep.subr.bf16.mxu1 %v6244_v8  ;;  %5687 = vmatprep.mubr.f32.mxu1 %v3388_v11  ;;  %v2792_v11 = vsub.f32 %v8455_v17, %v9302_v46  ;;  %v2813_v42 = vsub.f32 %v8507_v56, %v9303_v55 }
 0x2bc   : > { %5509 = vmatprep.mubr.msk.f32.mxu0 %vm9232_vm1, %v9194_v32  ;;  %v6250_v5 = vpack.c.bf16 %v2786_v10, %v2779_v16  ;;  %v2827_v10 = vsub.f32 %v8561_v20, %v2826_v50  ;;  %v2834_v50 = vsub.f32 %v8605_v2, %v2833_v57  ;;  %v6268_v57 = vpack.c.bf16 %v8359_v44, %v8348_v15 }
 0x2bd   : > { %6245 = vmatpush3.bf16.msra.mxu0 %v6244_v8  ;;  %5688 = vmatmul.mubr.f32.gmra.mrb[6].mxu1 %v3398_v18  ;;  %v2793_v18 = vand.u32 4294901760, %v2792_v11  ;;  %v2814_v34 = vand.u32 4294901760, %v2813_v42  ;;  %v2841_v11 = vsub.f32 %v8621_v22, %v2840_v60  ;;  %v6265_v60 = vpack.c.bf16 %v8306_v29, %v8298_v48 }
 0x2be   : > { %6399 = vmatpush3.bf16.msra.mxu1 %v6244_v8  ;;  %6246 = vmatprep.subr.bf16.mxu0 %v9208_v28  ;;  %v9304_v8 = vand.u32 4294901760, %v8498_v40  ;;  %v2828_v46 = vand.u32 4294901760, %v2827_v10  ;;  %v2835_v42 = vand.u32 4294901760, %v2834_v50  ;;  %v6271_v48 = vpack.c.bf16 %v8396_v39, %v8387_v3 }
 0x2bf   : > { %6401 = vmatprep.subr.bf16.mxu1 %v6247_v27  ;;  %5722 = vmatprep.mubr.f32.mxu1 %v8272_v25  ;;  %v6253_v9 = vpack.c.bf16 %v2800_v63, %v2793_v18  ;;  %v2821_v63 = vand.u32 4294901760, %v2820_v21  ;;  %v2842_v55 = vand.u32 4294901760, %v2841_v11  ;;  %v6274_v29 = vpack.c.bf16 %v8430_v6, %v8421_v59 }
 0x2c0   : > { %v2806_v43 = vsub.f32 %v8498_v40, %v9304_v8  ;;  %v6277_v15 = vpack.c.bf16 %v8468_v0, %v8455_v17  ;;  %v6280_v44 = vpack.c.bf16 %v8507_v56, %v8498_v40  ;;  %v6283_v3 = vpack.c.bf16 %v8561_v20, %v8537_v35 }
 0x2c1   : > { %6248 = vmatpush3.bf16.msra.mxu0 %v6247_v27  ;;  %v6262_v18 = vpack.c.bf16 %v2842_v55, %v2835_v42  ;;  %v6286_v39 = vpack.c.bf16 %v8621_v22, %v8605_v2  ;;  %v9306_v20 = vand.u32 4294901760, %v8286_v36  ;;  %v9308_v59 = vand.u32 4294901760, %v8523_v61 }
 0x2c2   : > { %6403 = vmatpush3.bf16.msra.mxu1 %v6247_v27  ;;  %6249 = vmatprep.subr.bf16.mxu0 %v9208_v28  ;;  %v2807_v27 = vand.u32 4294901760, %v2806_v43  ;;  %v9309_v6 = vand.u32 4294901760, %v8540_v33  ;;  %v9310_v2 = vand.u32 4294901760, %v8559_v58 }
 0x2c3   : > { %6405 = vmatprep.subr.bf16.mxu1 %v6250_v5 }
 0x2c4   : > { %v6256_v16 = vpack.c.bf16 %v2814_v34, %v2807_v27 }
 0x2c5   : > { %6251 = vmatpush3.bf16.msra.mxu0 %v6250_v5 }
 0x2c6   : > { %6407 = vmatpush3.bf16.msra.mxu1 %v6250_v5  ;;  %6252 = vmatprep.subr.bf16.mxu0 %v9208_v28  ;;  %v6259_v5 = vpack.c.bf16 %v2828_v46, %v2821_v63 }
 0x2c7   : > { %6409 = vmatprep.subr.bf16.mxu1 %v6253_v9 }
 0x2c9   : > { %6254 = vmatpush3.bf16.msra.mxu0 %v6253_v9 }
 0x2ca   : > { %6411 = vmatpush3.bf16.msra.mxu1 %v6253_v9  ;;  %6255 = vmatprep.subr.bf16.mxu0 %v9208_v28 }
 0x2cb   : > { %6413 = vmatprep.subr.bf16.mxu1 %v6256_v16 }
 0x2cd   : > { %6257 = vmatpush3.bf16.msra.mxu0 %v6256_v16 }
 0x2ce   : > { %6415 = vmatpush3.bf16.msra.mxu1 %v6256_v16  ;;  %6258 = vmatprep.subr.bf16.mxu0 %v9208_v28 }
 0x2cf   : > { %6417 = vmatprep.subr.bf16.mxu1 %v6259_v5 }
 0x2d1   : > { %6260 = vmatpush3.bf16.msra.mxu0 %v6259_v5 }
 0x2d2   : > { %6419 = vmatpush3.bf16.msra.mxu1 %v6259_v5  ;;  %6261 = vmatprep.subr.bf16.mxu0 %v9208_v28 }
 0x2d3   : > { %6421 = vmatprep.subr.bf16.mxu1 %v6262_v18 }
 0x2d5   : > { %6263 = vmatpush3.bf16.msra.mxu0 %v6262_v18 }
 0x2d6   : > { %6423 = vmatpush3.bf16.msra.mxu1 %v6262_v18  ;;  %6264 = vmatprep.subr.bf16.mxu0 %v9208_v28 }
 0x2d7   : > { %6425 = vmatprep.subr.bf16.mxu1 %v6265_v60 }
 0x2d8   : > { %5510 = vmatmul.mubr.f32.vlgmr.msra.gmra.mrb[2].mxu0 %v8486_v26 }
 0x2d9   : > { %6266 = vmatpush3.bf16.msra.mxu0 %v6265_v60  ;;  %5723 = vmatmul.mubr.f32.vlgmr.msra.gmra.mrb[4].mxu1 %v8489_v13 }
 0x2da   : > { %6427 = vmatpush3.bf16.msra.mxu1 %v6265_v60  ;;  %6267 = vmatprep.subr.bf16.mxu0 %v9208_v28 }
 0x2db   : > { %6429 = vmatprep.subr.bf16.mxu1 %v6268_v57  ;;  %5725 = vmatprep.mubr.f32.mxu1 %v8526_v62 }
 0x2dc   : > { %5544 = vmatprep.mubr.msk.f32.mxu0 %vm9232_vm1, %v9194_v32 }
 0x2dd   : > { %6269 = vmatpush3.bf16.msra.mxu0 %v6268_v57  ;;  %5726 = vmatmul.mubr.f32.gmra.mrb[6].mxu1 %v8535_v49 }
 0x2de   : > { %6431 = vmatpush3.bf16.msra.mxu1 %v6268_v57  ;;  %6270 = vmatprep.subr.bf16.mxu0 %v9208_v28 }
 0x2df   : > { %6433 = vmatprep.subr.bf16.mxu1 %v6271_v48  ;;  %5760 = vmatprep.mubr.f32.mxu1 %v8286_v36  ;;  %v9307_v36 = vand.u32 4294901760, %v8520_v14 }
 0x2e1   : > { %6272 = vmatpush3.bf16.msra.mxu0 %v6271_v48 }
 0x2e2   : > { %6435 = vmatpush3.bf16.msra.mxu1 %v6271_v48  ;;  %6273 = vmatprep.subr.bf16.mxu0 %v9208_v28 }
 0x2e3   : > { %6437 = vmatprep.subr.bf16.mxu1 %v6274_v29 }
 0x2e5   : > { %6275 = vmatpush3.bf16.msra.mxu0 %v6274_v29 }
 0x2e6   : > { %6439 = vmatpush3.bf16.msra.mxu1 %v6274_v29  ;;  %6276 = vmatprep.subr.bf16.mxu0 %v9208_v28 }
 0x2e7   : > { %6441 = vmatprep.subr.bf16.mxu1 %v6277_v15 }
 0x2e9   : > { %6278 = vmatpush3.bf16.msra.mxu0 %v6277_v15 }
 0x2ea   : > { %6443 = vmatpush3.bf16.msra.mxu1 %v6277_v15  ;;  %6279 = vmatprep.subr.bf16.mxu0 %v9208_v28 }
 0x2eb   : > { %6445 = vmatprep.subr.bf16.mxu1 %v6280_v44 }
 0x2ed   : > { %6281 = vmatpush3.bf16.msra.mxu0 %v6280_v44 }
 0x2ee   : > { %6447 = vmatpush3.bf16.msra.mxu1 %v6280_v44  ;;  %6282 = vmatprep.subr.bf16.mxu0 %v9208_v28 }
 0x2ef   : > { %6449 = vmatprep.subr.bf16.mxu1 %v6283_v3 }
 0x2f1   : > { %6284 = vmatpush3.bf16.msra.mxu0 %v6283_v3 }
 0x2f2   : > { %6451 = vmatpush3.bf16.msra.mxu1 %v6283_v3  ;;  %6285 = vmatprep.subr.bf16.mxu0 %v9208_v28 }
 0x2f3   : > { %6453 = vmatprep.subr.bf16.mxu1 %v6286_v39 }
 0x2f5   : > { %6287 = vmatpush3.bf16.msra.mxu0 %v6286_v39 }
 0x2f6   : > { %6455 = vmatpush3.bf16.msra.mxu1 %v6286_v39  ;;  %6288 = vmatprep.subr.bf16.mxu0 %v9208_v28 }
 0x2f7   : > { %6457 = vmatprep.subr.msk.bf16.mxu1 %vm8310_vm5, %v9206_v54 }
 0x2f8   : > { %5545 = vmatmul.mubr.f32.vlgmr.msra.gmra.mrb[2].mxu0 %v8520_v14 }
 0x2f9   : > { %6290 = vmatpush3.bf16.msk.msra.mxu0 %vm8310_vm5, %v9206_v54  ;;  %5761 = vmatmul.mubr.f32.vlgmr.msra.gmra.mrb[4].mxu1 %v8523_v61 }
 0x2fa   : > { %6459 = vmatpush3.bf16.msk.msra.mxu1 %vm8310_vm5, %v9206_v54  ;;  %6291 = vmatprep.subr.bf16.mxu0 %v9208_v28 }
 0x2fb   : > { %6461 = vmatprep.subr.msk.bf16.mxu1 %vm8353_vm11, %v9206_v54  ;;  %5763 = vmatprep.mubr.f32.mxu1 %v8540_v33 }
 0x2fc   : > { %5579 = vmatprep.mubr.msk.f32.mxu0 %vm9232_vm1, %v9194_v32 }
 0x2fd   : > { %6293 = vmatpush3.bf16.msk.msra.mxu0 %vm8353_vm11, %v9206_v54  ;;  %5764 = vmatmul.mubr.f32.gmra.mrb[6].mxu1 %v8559_v58 }
 0x2fe   : > { %6463 = vmatpush3.bf16.msk.msra.mxu1 %vm8353_vm11, %v9206_v54  ;;  %6294 = vmatprep.subr.bf16.mxu0 %v9208_v28 }
 0x2ff   : > { %6465 = vmatprep.subr.msk.bf16.mxu1 %vm8392_vm9, %v9206_v54  ;;  %5798 = vmatprep.mubr.f32.mxu1 %v9306_v20 }
 0x301   : > { %6296 = vmatpush3.bf16.msk.msra.mxu0 %vm8392_vm9, %v9206_v54 }
 0x302   : > { %6467 = vmatpush3.bf16.msk.msra.mxu1 %vm8392_vm9, %v9206_v54  ;;  %6297 = vmatprep.subr.bf16.mxu0 %v9208_v28 }
 0x303   : > { %6469 = vmatprep.subr.msk.bf16.mxu1 %vm8426_vm7, %v9206_v54 }
 0x305   : > { %6299 = vmatpush3.bf16.msk.msra.mxu0 %vm8426_vm7, %v9206_v54 }
 0x306   : > { %6471 = vmatpush3.bf16.msk.msra.mxu1 %vm8426_vm7, %v9206_v54  ;;  %6300 = vmatprep.subr.bf16.mxu0 %v9208_v28 }
 0x307   : > { %6473 = vmatprep.subr.msk.bf16.mxu1 %vm8460_vm13, %v9206_v54 }
 0x309   : > { %6302 = vmatpush3.bf16.msk.msra.mxu0 %vm8460_vm13, %v9206_v54 }
 0x30a   : > { %6475 = vmatpush3.bf16.msk.msra.mxu1 %vm8460_vm13, %v9206_v54  ;;  %6303 = vmatprep.subr.bf16.mxu0 %v9208_v28 }
 0x30b   : > { %6477 = vmatprep.subr.msk.bf16.mxu1 %vm8503_vm2, %v9206_v54 }
 0x30d   : > { %6305 = vmatpush3.bf16.msk.msra.mxu0 %vm8503_vm2, %v9206_v54 }
 0x30e   : > { %6479 = vmatpush3.bf16.msk.msra.mxu1 %vm8503_vm2, %v9206_v54  ;;  %6306 = vmatprep.subr.bf16.mxu0 %v9208_v28 }
 0x30f   : > { %6481 = vmatprep.subr.msk.bf16.mxu1 %vm8552_vm15, %v9206_v54 }
 0x311   : > { %6308 = vmatpush3.bf16.msk.msra.mxu0 %vm8552_vm15, %v9206_v54 }
 0x312   : > { %6483 = vmatpush3.bf16.msk.msra.mxu1 %vm8552_vm15, %v9206_v54  ;;  %6309 = vmatprep.subr.bf16.mxu0 %v9208_v28 }
 0x313   : > { %6485 = vmatprep.subr.msk.bf16.mxu1 %vm8614_vm6, %v9206_v54 }
 0x315   : > { %6311 = vmatpush3.bf16.msk.msra.mxu0 %vm8614_vm6, %v9206_v54 }
 0x316   : > { %6487 = vmatpush3.bf16.msk.msra.mxu1 %vm8614_vm6, %v9206_v54  ;;  %6312 = vmatprep.subr.bf16.mxu0 %v9208_v28 }
 0x317   : > { %6489 = vmatprep.subr.bf16.mxu1 %v8339_v38 }
 0x318   : > { %5580 = vmatmul.mubr.f32.vlgmr.msra.gmra.mrb[2].mxu0 %v9307_v36 }
 0x319   : > { %6314 = vmatpush3.bf16.msra.mxu0 %v8339_v38  ;;  %5799 = vmatmul.mubr.f32.vlgmr.msra.gmra.mrb[4].mxu1 %v9308_v59 }
 0x31a   : > { %6491 = vmatpush3.bf16.msra.mxu1 %v8339_v38  ;;  %6315 = vmatprep.subr.bf16.mxu0 %v9208_v28 }
 0x31b   : > { %6493 = vmatprep.subr.bf16.mxu1 %v8384_v53  ;;  %5801 = vmatprep.mubr.f32.mxu1 %v9309_v6 }
 0x31c   : > { %5614 = vmatprep.mubr.msk.f32.mxu0 %vm9232_vm1, %v9194_v32 }
 0x31d   : > { %6317 = vmatpush3.bf16.msra.mxu0 %v8384_v53  ;;  %5802 = vmatmul.mubr.f32.gmra.mrb[6].mxu1 %v9310_v2 }
 0x31e   : > { %6495 = vmatpush3.bf16.msra.mxu1 %v8384_v53  ;;  %6318 = vmatprep.subr.bf16.mxu0 %v9208_v28 }
 0x31f   : > { %6497 = vmatprep.subr.bf16.mxu1 %v8418_v1  ;;  %5836 = vmatprep.mubr.f32.mxu1 %v8272_v25 }
 0x321   : > { %6320 = vmatpush3.bf16.msra.mxu0 %v8418_v1 }
 0x322   : > { %6499 = vmatpush3.bf16.msra.mxu1 %v8418_v1  ;;  %6321 = vmatprep.subr.bf16.mxu0 %v9208_v28 }
 0x323   : > { %6501 = vmatprep.subr.bf16.mxu1 %v8452_v4 }
 0x325   : > { %6323 = vmatpush3.bf16.msra.mxu0 %v8452_v4 }
 0x326   : > { %6503 = vmatpush3.bf16.msra.mxu1 %v8452_v4  ;;  %6324 = vmatprep.subr.bf16.mxu0 %v9208_v28 }
 0x327   : > { %6505 = vmatprep.subr.bf16.mxu1 %v8495_v7 }
 0x329   : > { %6326 = vmatpush3.bf16.msra.mxu0 %v8495_v7 }
 0x32a   : > { %6507 = vmatpush3.bf16.msra.mxu1 %v8495_v7  ;;  %6327 = vmatprep.subr.bf16.mxu0 %v9208_v28 }
 0x32b   : > { %6509 = vmatprep.subr.bf16.mxu1 %v8546_v47 }
 0x32d   : > { %6329 = vmatpush3.bf16.msra.mxu0 %v8546_v47 }
 0x32e   : > { %6511 = vmatpush3.bf16.msra.mxu1 %v8546_v47  ;;  %6330 = vmatprep.subr.bf16.mxu0 %v9208_v28 }
 0x32f   : > { %6513 = vmatprep.subr.bf16.mxu1 %v8600_v12 }
 0x331   : > { %6332 = vmatpush3.bf16.msra.mxu0 %v8600_v12 }
 0x332   : > { %6515 = vmatpush3.bf16.msra.mxu1 %v8600_v12  ;;  %6333 = vmatprep.subr.bf16.mxu0 %v9208_v28 }
 0x333   : > { %6517 = vmatprep.subr.bf16.mxu1 %v8644_v23 }
 0x335   : > { %6335 = vmatpush3.bf16.msra.mxu0 %v8644_v23 }
 0x336   : > { %6519 = vmatpush3.bf16.msra.mxu1 %v8644_v23  ;;  %6336 = vmatprep.subr.bf16.mxu0 %v9208_v28 }
 0x337   : > { %6521 = vmatprep.subr.msk.bf16.mxu1 %vm8310_vm5, %v9206_v54 }
 0x338   : > { %5615 = vmatmul.mubr.f32.vlgmr.msra.gmra.mrb[2].mxu0 %v8486_v26 }
 0x339   : > { %6338 = vmatpush3.bf16.msk.msra.mxu0 %vm8310_vm5, %v9206_v54  ;;  %5837 = vmatmul.mubr.f32.vlgmr.msra.gmra.mrb[4].mxu1 %v8489_v13 }
 0x33a   : > { %6523 = vmatpush3.bf16.msk.msra.mxu1 %vm8310_vm5, %v9206_v54  ;;  %6339 = vmatprep.subr.bf16.mxu0 %v9208_v28 }
 0x33b   : > { %6525 = vmatprep.subr.msk.bf16.mxu1 %vm8353_vm11, %v9206_v54  ;;  %5839 = vmatprep.mubr.f32.mxu1 %v8526_v62 }
 0x33c   : > { %5649 = vmatprep.mubr.msk.f32.mxu0 %vm9232_vm1, %v9194_v32 }
 0x33d   : > { %6341 = vmatpush3.bf16.msk.msra.mxu0 %vm8353_vm11, %v9206_v54  ;;  %5840 = vmatmul.mubr.f32.gmra.mrb[6].mxu1 %v8535_v49 }
 0x33e   : > { %6527 = vmatpush3.bf16.msk.msra.mxu1 %vm8353_vm11, %v9206_v54  ;;  %6342 = vmatprep.subr.bf16.mxu0 %v9208_v28 }
 0x33f   : > { %6529 = vmatprep.subr.msk.bf16.mxu1 %vm8392_vm9, %v9206_v54  ;;  %5874 = vmatprep.mubr.f32.mxu1 %v8272_v25 }
 0x341   : > { %6344 = vmatpush3.bf16.msk.msra.mxu0 %vm8392_vm9, %v9206_v54 }
 0x342   : > { %6531 = vmatpush3.bf16.msk.msra.mxu1 %vm8392_vm9, %v9206_v54  ;;  %6345 = vmatprep.subr.bf16.mxu0 %v9208_v28 }
 0x343   : > { %6533 = vmatprep.subr.msk.bf16.mxu1 %vm8426_vm7, %v9206_v54 }
 0x345   : > { %6347 = vmatpush3.bf16.msk.msra.mxu0 %vm8426_vm7, %v9206_v54 }
 0x346   : > { %6535 = vmatpush3.bf16.msk.msra.mxu1 %vm8426_vm7, %v9206_v54  ;;  %6348 = vmatprep.subr.bf16.mxu0 %v9208_v28 }
 0x347   : > { %6537 = vmatprep.subr.msk.bf16.mxu1 %vm8460_vm13, %v9206_v54 }
 0x349   : > { %6350 = vmatpush3.bf16.msk.msra.mxu0 %vm8460_vm13, %v9206_v54 }
 0x34a   : > { %6539 = vmatpush3.bf16.msk.msra.mxu1 %vm8460_vm13, %v9206_v54  ;;  %6351 = vmatprep.subr.bf16.mxu0 %v9208_v28 }
 0x34b   : > { %6541 = vmatprep.subr.msk.bf16.mxu1 %vm8503_vm2, %v9206_v54 }
 0x34d   : > { %6353 = vmatpush3.bf16.msk.msra.mxu0 %vm8503_vm2, %v9206_v54 }
 0x34e   : > { %6543 = vmatpush3.bf16.msk.msra.mxu1 %vm8503_vm2, %v9206_v54  ;;  %6354 = vmatprep.subr.bf16.mxu0 %v9208_v28 }
 0x34f   : > { %6545 = vmatprep.subr.msk.bf16.mxu1 %vm8552_vm15, %v9206_v54 }
 0x351   : > { %6356 = vmatpush3.bf16.msk.msra.mxu0 %vm8552_vm15, %v9206_v54 }
 0x352   : > { %6547 = vmatpush3.bf16.msk.msra.mxu1 %vm8552_vm15, %v9206_v54  ;;  %6357 = vmatprep.subr.bf16.mxu0 %v9208_v28 }
 0x353   : > { %6549 = vmatprep.subr.msk.bf16.mxu1 %vm8614_vm6, %v9206_v54 }
 0x354   : > { %v1476_v32 = vpop.f32.mrb[0].mxu0 }
 0x355   : > { %6359 = vmatpush3.bf16.msk.msra.mxu0 %vm8614_vm6, %v9206_v54  ;;  %v5438_v25 = vpop.f32.mrb[0].mxu1  ;;  %1480 = vst [vmem:[%s397_s23] sm:$0x7] %v1476_v32  ;;  %v5213_v37 = vpop.f32.mrb[1].mxu0 }
 0x356   : > { %2252 = vst [vmem:[%s378_s9 + $0x8] sm:$0xff] %v5438_v25  ;;  %6551 = vmatpush3.bf16.msk.msra.mxu1 %vm8614_vm6, %v9206_v54  ;;  %v2229_v28 = vpop.f32.mrb[1].mxu1 }
 0x357   : > { %2251 = vst [vmem:[%s378_s9] sm:$0xff] %v2229_v28 }
 0x358   : > { %5650 = vmatmul.mubr.f32.vlgmr.msra.gmra.mrb[2].mxu0 %v8486_v26 }
 0x359   : > { %5875 = vmatmul.mubr.f32.vlgmr.msra.gmra.mrb[4].mxu1 %v8489_v13  ;;  %v5441_v38 = vpop.f32.mrb[2].mxu1 }
 0x35a   : > { %2254 = vst [vmem:[%s378_s9 + $0x18] sm:$0xff] %v5441_v38  ;;  %v2241_v19 = vpop.f32.mrb[3].mxu1  ;;  %5877 = vmatprep.mubr.f32.mxu1 %v8526_v62 }
 0x35b   : > { %2253 = vst [vmem:[%s378_s9 + $0x10] sm:$0xff] %v2241_v19 }
 0x35d   : > { %5878 = vmatmul.mubr.f32.gmra.mrb[6].mxu1 %v8535_v49 }
 0x35e   : > { %6756 = shalt.err (!%p6753_p3)
}
 0x35f   : > { %s6757_s22 = scalar_lea.hbm %s8945_s18, 512  ;;  %s6761_s12 = scalar_lea.hbm %s9039_s6, 1024 }
 0x360   : > { %p6758_p8 = scmp.ne.s32.totalorder %s8945_s18, %s6757_s22  ;;  %p6762_p4 = scmp.lt.u32.totalorder %s8945_s18, %s9039_s6 }
 0x361   : > { %p6763_p6 = scmp.lt.u32.totalorder %s6761_s12, %s6757_s22  ;;  %p6765_p1 = scmp.lt.u32.totalorder %s6757_s22, %s8945_s18 }
 0x362   : > { %p6759_p0 = pnand %p6758_p8, %p9311_p12 }
 0x363   : > { %p6764_p13 = por %p6763_p6, %p6762_p4 }
 0x364   : > { %p6760_p2 = pneg %p6759_p0 }
 0x365   : > { %p6766_p10 = por %p6765_p1, %p6764_p13 }
 0x367   : > { %p6767_p5 = pnand %p6766_p10, %p6760_p2 }
 0x369   : > { %6770 = shalt.err (!%p6767_p5)
}
 0x36a   : > { %s6857_s2 = smov 128   ;;  %s6858_s29 = smov 8  }
 0x36b   : > { %6616 = dma.vmem_to_hbm [thread:$0]  (%p9311_p12), %s8937_s10, 512, %s8945_s18, %s4066_s20, %s6857_s2, %s6857_s2, %s6858_s29  }
 0x36c   : > { %s401_s23 = scalar_lea.vmem %s9038_s5, %s7584_s11  ;;  %s385_s9 = scalar_lea.vmem [#allocation8], %s7063_s16 }
 0x36d   : > { %s4106_s12 = sshll.u32 %s385_s9, 4  ;;  %s8986_s18 = scalar_lea.hbm %s9040_s7, %s4558_s15  ;;  %s8979_s12 = int_to_ptr.vmem [resolvable:$true] %s4106_s12 }
 0x36e   : > { %s4071_s16 = scalar_lea.sflag [#allocation9], %s7060_s21  ;;  %s6771_s20 = scalar_lea.vmem %s8979_s12, 512 }
 0x36f   : > { %p6772_p7 = scmp.ne.s32.totalorder %s8979_s12, %s6771_s20  ;;  %s6859_s17 = smov [#allocation8]  }
 0x370   : > { %s6775_s19 = sshll.u32 %s6859_s17, 4  ;;  %s6776_s19 = int_to_ptr.vmem [resolvable:$false] %s6775_s19 }
 0x371   : > { %p6773_p9 = pnand %p6772_p7, %p9311_p12  ;;  %s6777_s8 = scalar_lea.vmem %s6776_s19, 1024 }
 0x372   : > { %p6778_p3 = scmp.lt.s32.totalorder %s8979_s12, %s6776_s19  ;;  %p6779_p8 = scmp.lt.s32.totalorder %s6777_s8, %s6771_s20 }
 0x373   : > { %p6774_p11 = pneg %p6773_p9 }
 0x374   : > { %p6780_p0 = por %p6779_p8, %p6778_p3 }
 0x376   : > { %p6781_p2 = pnand %p6780_p0, %p6774_p11 }
 0x42b   : > { %v3278_v54 = vpop.f32.mrb[2].mxu0 }
 0x42c   : > { %3282 = vst [vmem:[%s401_s23] sm:$0x7] %v3278_v54  ;;  %v5651_v53 = vpop.f32.mrb[3].mxu0  ;;  %v5876_v45 = vpop.f32.mrb[4].mxu1 }
 0x42d   : > { %4054 = vst [vmem:[%s385_s9 + $0x8] sm:$0xff] %v5876_v45  ;;  %v4031_v1 = vpop.f32.mrb[5].mxu1 }
 0x42e   : > { %4053 = vst [vmem:[%s385_s9] sm:$0xff] %v4031_v1 }
 0x430   : > { %v5879_v24 = vpop.f32.mrb[6].mxu1 }
 0x431   : > { %4056 = vst [vmem:[%s385_s9 + $0x18] sm:$0xff] %v5879_v24  ;;  %v4043_v12 = vpop.f32.mrb[7].mxu1 }
 0x432   : > { %4055 = vst [vmem:[%s385_s9 + $0x10] sm:$0xff] %v4043_v12 }
 0x433   : > { %6784 = shalt.err (!%p6781_p2)
}
 0x434   : > { %s6785_s28 = scalar_lea.hbm %s8986_s18, 512  ;;  %s6789_s23 = scalar_lea.hbm %s9040_s7, 1024 }
 0x435   : > { %p6786_p4 = scmp.ne.s32.totalorder %s8986_s18, %s6785_s28  ;;  %p6790_p1 = scmp.lt.u32.totalorder %s8986_s18, %s9040_s7 }
 0x436   : > { %p6791_p10 = scmp.lt.u32.totalorder %s6789_s23, %s6785_s28  ;;  %p6793_p7 = scmp.lt.u32.totalorder %s6785_s28, %s8986_s18 }
 0x437   : > { %p6787_p6 = pnand %p6786_p4, %p9311_p12 }
 0x438   : > { %p6792_p5 = por %p6791_p10, %p6790_p1 }
 0x439   : > { %p6788_p13 = pneg %p6787_p6 }
 0x43a   : > { %p6794_p9 = por %p6793_p7, %p6792_p5 }
 0x43c   : > { %p6795_p11 = pnand %p6794_p9, %p6788_p13 }
 0x43e   : > { %6798 = shalt.err (!%p6795_p11)
}
 0x43f   : > { %6617 = dma.vmem_to_hbm [thread:$0]  (%p9311_p12), %s8979_s12, 512, %s8986_s18, %s4071_s16, %s6857_s2, %s6857_s2, %s6858_s29  }
 0x440 PF: > { %s4135_s11 = sand.u32 1, %s6833_s24   ;;  %p9312_p3 = scmp.ne.s32.totalorder %s9145_s14, 0 }
 0x441   : > { %p9313_p8 = scmp.ge.s32.totalorder %s6845_s27, 2  ;;  %s4136_s20 = scalar_lea.sflag [#allocation4], %s4135_s11 }
 0x443   : > { %p6628_p0 = pnand %p9313_p8, %p9312_p3 }
 0x445   : > { %6824 = dma.done.wait (!%p6628_p0), %s4136_s20, 512  }
 0x446   : > { %6826 = vsyncadd (!%p6628_p0), %s4136_s20, 4294966784  ;;  %s4145_s13 = scalar_lea.sflag [#allocation9], %s4135_s11 }
 0x447   : > { %6828 = dma.done.wait (!%p6628_p0), %s4145_s13, 512  }
 0x448   : > { %6830 = vsyncadd (!%p6628_p0), %s4145_s13, 4294966784  ;;  %s9314_s21 = sld [smem:[#allocation14_spill]]  ;;  %p27_p12 = scmp.ge.s32.totalorder %s6925_s30, 4  }
 0x449   : > { %s9315_s24 = smov %s6837_s25  ;;  %s9316_s25 = smov %s6841_s26 }
 0x44a   : > { %s9318_s27 = smov %s6925_s30  ;;  %29 = sbr.rel (!%p27_p12) target bundleno = 11 (0xb), region = 141 }
 0x44e   : > { %s9317_s26 = smov %s9314_s21 }
 0x451   :  { %4150 = vsyncpa [#allocation3], 1 }
 0x452   :  { %4152 = vsyncpa [#allocation3 + $0x1], 1 }
 0x453   :  { %4153 = vsyncpa [#allocation6], 1 }
 0x454   :  { %4155 = vsyncpa [#allocation6 + $0x1], 1 }
 0x455   :  { %4156 = vsyncpa [#allocation4], 1 }
 0x456   :  { %4158 = vsyncpa [#allocation4 + $0x1], 1 }
 0x457   :  { %4159 = vsyncpa [#allocation9], 1 }
 0x458   :  { %4161 = vsyncpa [#allocation9 + $0x1], 1 }

</bundles_post_ra>
